<compile_context>
chip_gen: v7x
topology: tpu7x:2x2x1
jax: 0.10.0
libtpu: 0.0.40
codegen_flags: <defaults>
</compile_context>

<pallas_src>
import jax
import jax.numpy as jnp
from jax.experimental import pallas as pl
from jax.experimental.pallas import tpu as pltpu

# ---------------- model hyper-parameters (small, synthetic) ----------------
VOCAB = 100
MAX_POS = 16
TYPE_VOCAB = 2
HIDDEN = 128
NUM_HEADS = 4
HEAD_DIM = HIDDEN // NUM_HEADS
FFN = 256
NUM_LAYERS = 2
N_OUT = 1
LN_EPS = 1e-12
LANE = 128          # lane-padded output width for the classifier head


# ---------------------------- kernel helpers -------------------------------
def _layernorm(x, gamma, beta, eps=LN_EPS):
    mu = jnp.mean(x, axis=-1, keepdims=True)
    var = jnp.mean((x - mu) * (x - mu), axis=-1, keepdims=True)
    return (x - mu) * jax.lax.rsqrt(var + eps) * gamma + beta


# --------------------------- fused Pallas kernel ----------------------------
def fused_forward_kernel(emb_ref, bias_ref, eg_ref, eb_ref,
                         wqkv_ref, bqkv_ref, wo_ref, bo_ref,
                         ln1g_ref, ln1b_ref, w1_ref, b1_ref,
                         w2_ref, b2_ref, ln2g_ref, ln2b_ref,
                         wp_ref, bp_ref, wout_ref, bout_ref,
                         out_ref, x_scratch):
    bias = bias_ref[...]                                     # (R, R) additive mask

    # embedding LayerNorm
    x = _layernorm(emb_ref[...], eg_ref[...], eb_ref[...])   # (R, H) f32

    for l in range(NUM_LAYERS):                              # static unroll (L=2)
        # ---- fused QKV projection: one MXU pass, bf16 operands ----
        # 1/sqrt(head_dim) is pre-folded into the Q columns of wqkv/bqkv.
        qkv = jnp.dot(x.astype(jnp.bfloat16), wqkv_ref[l],
                      preferred_element_type=jnp.float32) + bqkv_ref[l]
        qkv_bf = qkv.astype(jnp.bfloat16)                    # single cast
        q = qkv_bf[:, :HIDDEN]
        k = qkv_bf[:, HIDDEN:2 * HIDDEN]
        v = qkv_bf[:, 2 * HIDDEN:]

        # ---- attention: per-head scores over ALL (batch*seq) rows at once ----
        # cross-batch attention blocked by the block-diagonal additive bias;
        # head contexts are lane-concatenated and projected through Wo with a
        # single full-K (K=128) MXU pass.
        ctxs = []
        for h in range(NUM_HEADS):
            sl = slice(h * HEAD_DIM, (h + 1) * HEAD_DIM)
            s = jax.lax.dot_general(q[:, sl], k[:, sl], (((1,), (1,)), ((), ())),
                                    preferred_element_type=jnp.float32) + bias
            s = s - jnp.max(s, axis=-1, keepdims=True)
            p = jnp.exp(s)
            p = p * pl.reciprocal(jnp.sum(p, axis=-1, keepdims=True), approx=True)
            ctxs.append(jnp.dot(p.astype(jnp.bfloat16), v[:, sl],
                                preferred_element_type=jnp.float32))
        ctx_full = jnp.concatenate(ctxs, axis=-1).astype(jnp.bfloat16)   # (R, H)
        attn = jnp.dot(ctx_full, wo_ref[l],
                       preferred_element_type=jnp.float32) + bo_ref[l]

        h1 = _layernorm(x + attn, ln1g_ref[l], ln1b_ref[l])

        # ---- feed-forward ----
        ff = jnp.dot(h1.astype(jnp.bfloat16), w1_ref[l],
                     preferred_element_type=jnp.float32) + b1_ref[l]
        # TODO(synk): tanh-approx GELU (PyTorch nn.GELU default is exact erf).
        # Kept in f32 so the path is native on v5e; on v6e/v7x this GELU could
        # run in bf16 to halve vregs for the (R, FFN) tile.
        ff = jax.nn.gelu(ff, approximate=True)
        ff = jnp.dot(ff.astype(jnp.bfloat16), w2_ref[l],
                     preferred_element_type=jnp.float32) + b2_ref[l]
        x = _layernorm(h1 + ff, ln2g_ref[l], ln2b_ref[l])

    # ---- BERT pooler + classifier head on CLS rows only (dropout == identity) ----
    # CLS rows (one per batch, at row b*S) are gathered with a sublane-strided
    # read from a VMEM scratch; the kernel output stays lane-dense (B, 128).
    x_scratch[...] = x
    n_cls = out_ref.shape[0]                                 # == batch size B
    stride = x_scratch.shape[0] // n_cls                     # == seq len S
    cls = x_scratch[pl.ds(0, n_cls, stride=stride), :]       # (B, H)
    pooled = jnp.tanh(jnp.dot(cls.astype(jnp.bfloat16), wp_ref[...],
                              preferred_element_type=jnp.float32) + bp_ref[...])
    logits = jnp.dot(pooled.astype(jnp.bfloat16), wout_ref[...],
                     preferred_element_type=jnp.float32) + bout_ref[...]
    out_ref[...] = logits.astype(out_ref.dtype)


# ----------------------------- full forward ----------------------------------
@jax.jit
def transformer_with_cls_forward(params, ids, mask, token_type_ids):
    B, S = ids.shape
    R = B * S

    # embeddings (gather stays in XLA; no clean single-kernel Pallas gather here)
    emb = (jnp.take(params["word_emb"], ids, axis=0)
           + params["pos_emb"][:S][None, :, :]
           + jnp.take(params["type_emb"], token_type_ids, axis=0))
    emb = emb.reshape(R, HIDDEN).astype(jnp.float32)

    # additive attention bias: BERT-style padding mask (-10000 on masked keys)
    # combined with a block-diagonal batch mask (all B*S rows attend jointly
    # inside the kernel). NOTE: this joint (B*S)^2 form is fine at R=16; switch
    # to per-batch (B, S, S) biases before scaling (v7x VMEM).
    batch_idx = jnp.repeat(jnp.arange(B, dtype=jnp.int32), S)
    same_batch = batch_idx[:, None] == batch_idx[None, :]
    key_mask = mask.reshape(R).astype(jnp.float32)
    attn_bias = jnp.where(same_batch,
                          (key_mask[None, :] - 1.0) * 10000.0,
                          jnp.float32(-1e9)).astype(jnp.float32)

    args = (emb, attn_bias, params["emb_ln_g"], params["emb_ln_b"],
            params["wqkv"], params["bqkv"], params["wo"], params["bo"],
            params["ln1_g"], params["ln1_b"], params["w1"], params["b1"],
            params["w2"], params["b2"], params["ln2_g"], params["ln2_b"],
            params["pooler_w"], params["pooler_b"],
            params["out_w_pad"], params["out_b_pad"])

    # advisory cost hint so XLA schedules the gather/mask build around the call
    flops = (NUM_LAYERS * (2 * R * HIDDEN * 3 * HIDDEN      # QKV
                           + 4 * R * R * HIDDEN             # scores + p@v
                           + 2 * R * HIDDEN * HIDDEN        # Wo
                           + 4 * R * HIDDEN * FFN)          # FFN
             + 2 * B * HIDDEN * HIDDEN + 2 * B * HIDDEN * LANE)
    transcendentals = NUM_LAYERS * (NUM_HEADS * R * R + R * FFN) + B * HIDDEN
    bytes_accessed = (sum(int(a.size) * a.dtype.itemsize for a in args)
                      + B * LANE * 4)

    out = pl.pallas_call(
        fused_forward_kernel,
        out_shape=jax.ShapeDtypeStruct((B, LANE), jnp.float32),
        in_specs=[pl.BlockSpec(memory_space=pltpu.MemorySpace.VMEM)] * len(args),
        out_specs=pl.BlockSpec(memory_space=pltpu.MemorySpace.VMEM),
        scratch_shapes=[pltpu.VMEM((R, HIDDEN), jnp.float32)],
        cost_estimate=pl.CostEstimate(flops=flops,
                                      transcendentals=transcendentals,
                                      bytes_accessed=bytes_accessed),
    )(*args)
    # TODO(synk): add a row-parallel grid (dimension_semantics=("parallel",))
    # for v7x's second TensorCore once R grows beyond a single tile.

    # classifier was lane-padded to 128; take the first N_OUT columns.
    logits = out[:, :N_OUT]
    return logits


# ----------------------------- parameter init --------------------------------
def init_params(key):
    scale = 0.02
    attn_scale = 1.0 / (HEAD_DIM ** 0.5)

    def nrm(k, shape):
        return scale * jax.random.normal(k, shape, dtype=jnp.float32)

    keys = jax.random.split(key, 6)
    word_emb = nrm(keys[0], (VOCAB, HIDDEN))
    pos_emb = nrm(keys[1], (MAX_POS, HIDDEN))
    type_emb = nrm(keys[2], (TYPE_VOCAB, HIDDEN))
    pooler_w = nrm(keys[3], (HIDDEN, HIDDEN))
    out_w = nrm(keys[4], (HIDDEN, N_OUT))

    wqkv, wo, w1, w2 = [], [], [], []
    layer_keys = jax.random.split(keys[5], NUM_LAYERS)
    for l in range(NUM_LAYERS):
        lk = jax.random.split(layer_keys[l], 6)
        # fold 1/sqrt(head_dim) into the Q columns (the Q bias, zero here,
        # would carry the same fold).
        wq = nrm(lk[0], (HIDDEN, HIDDEN)) * attn_scale
        wk = nrm(lk[1], (HIDDEN, HIDDEN))
        wv = nrm(lk[2], (HIDDEN, HIDDEN))
        wqkv.append(jnp.concatenate([wq, wk, wv], axis=1))
        wo.append(nrm(lk[3], (HIDDEN, HIDDEN)))
        w1.append(nrm(lk[4], (HIDDEN, FFN)))
        w2.append(nrm(lk[5], (FFN, HIDDEN)))

    out_w_pad = jnp.zeros((HIDDEN, LANE), jnp.float32).at[:, :N_OUT].set(out_w)

    return {
        "word_emb": word_emb,
        "pos_emb": pos_emb,
        "type_emb": type_emb,
        "emb_ln_g": jnp.ones((1, HIDDEN), jnp.float32),
        "emb_ln_b": jnp.zeros((1, HIDDEN), jnp.float32),
        "wqkv": jnp.stack(wqkv).astype(jnp.bfloat16),          # (L, H, 3H), Q cols pre-scaled
        "bqkv": jnp.zeros((NUM_LAYERS, 1, 3 * HIDDEN), jnp.float32),
        "wo": jnp.stack(wo).astype(jnp.bfloat16),              # (L, H, H)
        "bo": jnp.zeros((NUM_LAYERS, 1, HIDDEN), jnp.float32),
        "ln1_g": jnp.ones((NUM_LAYERS, 1, HIDDEN), jnp.float32),
        "ln1_b": jnp.zeros((NUM_LAYERS, 1, HIDDEN), jnp.float32),
        "w1": jnp.stack(w1).astype(jnp.bfloat16),              # (L, H, F)
        "b1": jnp.zeros((NUM_LAYERS, 1, FFN), jnp.float32),
        "w2": jnp.stack(w2).astype(jnp.bfloat16),              # (L, F, H)
        "b2": jnp.zeros((NUM_LAYERS, 1, HIDDEN), jnp.float32),
        "ln2_g": jnp.ones((NUM_LAYERS, 1, HIDDEN), jnp.float32),
        "ln2_b": jnp.zeros((NUM_LAYERS, 1, HIDDEN), jnp.float32),
        "pooler_w": pooler_w.astype(jnp.bfloat16),
        "pooler_b": jnp.zeros((1, HIDDEN), jnp.float32),
        "out_w_pad": out_w_pad.astype(jnp.bfloat16),           # (H, 128), cols >= N_OUT are 0
        "out_b_pad": jnp.zeros((1, LANE), jnp.float32),
    }


# --------------------------------- main ---------------------------------------
if __name__ == "__main__":
    B, S = 2, 8
    key = jax.random.PRNGKey(0)
    k_ids, k_params = jax.random.split(key)

    ids = jax.random.randint(k_ids, (B, S), 0, VOCAB, dtype=jnp.int32)
    mask = jnp.ones((B, S), dtype=jnp.int32)
    token_type_ids = jnp.zeros((B, S), dtype=jnp.int32)

    params = init_params(k_params)

    out = transformer_with_cls_forward(params, ids, mask, token_type_ids)
    out = jax.block_until_ready(out)
    assert out.shape == (B, N_OUT)
    print("KERNEL_OK")
</pallas_src>

<mosaic_0001>
module attributes {stable_mosaic.version = 11 : i64} {
  func.func @fused_forward_kernel(%arg0: memref<16x128xf32, #tpu.memory_space<vmem>>, %arg1: memref<16x16xf32, #tpu.memory_space<vmem>>, %arg2: memref<1x128xf32, #tpu.memory_space<vmem>>, %arg3: memref<1x128xf32, #tpu.memory_space<vmem>>, %arg4: memref<2x128x384xbf16, #tpu.memory_space<vmem>>, %arg5: memref<2x1x384xf32, #tpu.memory_space<vmem>>, %arg6: memref<2x128x128xbf16, #tpu.memory_space<vmem>>, %arg7: memref<2x1x128xf32, #tpu.memory_space<vmem>>, %arg8: memref<2x1x128xf32, #tpu.memory_space<vmem>>, %arg9: memref<2x1x128xf32, #tpu.memory_space<vmem>>, %arg10: memref<2x128x256xbf16, #tpu.memory_space<vmem>>, %arg11: memref<2x1x256xf32, #tpu.memory_space<vmem>>, %arg12: memref<2x256x128xbf16, #tpu.memory_space<vmem>>, %arg13: memref<2x1x128xf32, #tpu.memory_space<vmem>>, %arg14: memref<2x1x128xf32, #tpu.memory_space<vmem>>, %arg15: memref<2x1x128xf32, #tpu.memory_space<vmem>>, %arg16: memref<128x128xbf16, #tpu.memory_space<vmem>>, %arg17: memref<1x128xf32, #tpu.memory_space<vmem>>, %arg18: memref<128x128xbf16, #tpu.memory_space<vmem>>, %arg19: memref<1x128xf32, #tpu.memory_space<vmem>>, %arg20: memref<2x128xf32, #tpu.memory_space<vmem>>, %arg21: memref<16x128xf32, #tpu.memory_space<vmem>>) attributes {dimension_semantics = [], scalar_prefetch = 0 : i64, scratch_operands = 1 : i64, tpu.core_type = #tpu.core_type<tc>} {
    %c0 = arith.constant 0 : index
    %c0_0 = arith.constant 0 : index
    %0 = vector.load %arg1[%c0, %c0_0] : memref<16x16xf32, #tpu.memory_space<vmem>>, vector<16x16xf32>
    %c0_1 = arith.constant 0 : index
    %c0_2 = arith.constant 0 : index
    %1 = vector.load %arg0[%c0_1, %c0_2] : memref<16x128xf32, #tpu.memory_space<vmem>>, vector<16x128xf32>
    %c0_3 = arith.constant 0 : index
    %c0_4 = arith.constant 0 : index
    %2 = vector.load %arg2[%c0_3, %c0_4] : memref<1x128xf32, #tpu.memory_space<vmem>>, vector<1x128xf32>
    %c0_5 = arith.constant 0 : index
    %c0_6 = arith.constant 0 : index
    %3 = vector.load %arg3[%c0_5, %c0_6] : memref<1x128xf32, #tpu.memory_space<vmem>>, vector<1x128xf32>
    %cst = arith.constant dense<0.000000e+00> : vector<16xf32>
    %4 = vector.multi_reduction <add>, %1, %cst [1] : vector<16x128xf32> to vector<16xf32>
    %5 = vector.shape_cast %4 : vector<16xf32> to vector<16x1xf32>
    %cst_7 = arith.constant 1.280000e+02 : f32
    %6 = vector.broadcast %cst_7 : f32 to vector<16x1xf32>
    %7 = arith.divf %5, %6 : vector<16x1xf32>
    %8 = vector.broadcast %7 : vector<16x1xf32> to vector<16x128xf32>
    %9 = arith.subf %1, %8 : vector<16x128xf32>
    %10 = vector.broadcast %7 : vector<16x1xf32> to vector<16x128xf32>
    %11 = arith.subf %1, %10 : vector<16x128xf32>
    %12 = arith.mulf %9, %11 : vector<16x128xf32>
    %cst_8 = arith.constant dense<0.000000e+00> : vector<16xf32>
    %13 = vector.multi_reduction <add>, %12, %cst_8 [1] : vector<16x128xf32> to vector<16xf32>
    %14 = vector.shape_cast %13 : vector<16xf32> to vector<16x1xf32>
    %cst_9 = arith.constant 1.280000e+02 : f32
    %15 = vector.broadcast %cst_9 : f32 to vector<16x1xf32>
    %16 = arith.divf %14, %15 : vector<16x1xf32>
    %17 = vector.broadcast %7 : vector<16x1xf32> to vector<16x128xf32>
    %18 = arith.subf %1, %17 : vector<16x128xf32>
    %cst_10 = arith.constant 9.99999996E-13 : f32
    %19 = vector.broadcast %cst_10 : f32 to vector<16x1xf32>
    %20 = arith.addf %16, %19 : vector<16x1xf32>
    %21 = math.rsqrt %20 : vector<16x1xf32>
    %22 = vector.broadcast %21 : vector<16x1xf32> to vector<16x128xf32>
    %23 = arith.mulf %18, %22 : vector<16x128xf32>
    %24 = vector.broadcast %2 : vector<1x128xf32> to vector<16x128xf32>
    %25 = arith.mulf %23, %24 : vector<16x128xf32>
    %26 = vector.broadcast %3 : vector<1x128xf32> to vector<16x128xf32>
    %27 = arith.addf %25, %26 : vector<16x128xf32>
    %28 = arith.truncf %27 : vector<16x128xf32> to vector<16x128xbf16>
    %c0_11 = arith.constant 0 : index
    %c0_12 = arith.constant 0 : index
    %c0_13 = arith.constant 0 : index
    %29 = vector.load %arg4[%c0_11, %c0_12, %c0_13] : memref<2x128x384xbf16, #tpu.memory_space<vmem>>, vector<1x128x384xbf16>
    %30 = vector.shape_cast %29 : vector<1x128x384xbf16> to vector<128x384xbf16>
    %cst_14 = arith.constant dense<0.000000e+00> : vector<16x384xf32>
    %31 = tpu.matmul %28, %30, %cst_14 {dimension_numbers = #tpu.dot_dimension_numbers<[1], [0], [0], [1], [0, 0, 1, 1], [], []>} : vector<16x128xbf16>, vector<128x384xbf16>, vector<16x384xf32> -> vector<16x384xf32>
    %c0_15 = arith.constant 0 : index
    %c0_16 = arith.constant 0 : index
    %c0_17 = arith.constant 0 : index
    %32 = vector.load %arg5[%c0_15, %c0_16, %c0_17] : memref<2x1x384xf32, #tpu.memory_space<vmem>>, vector<1x1x384xf32>
    %33 = vector.shape_cast %32 : vector<1x1x384xf32> to vector<1x384xf32>
    %34 = vector.broadcast %33 : vector<1x384xf32> to vector<16x384xf32>
    %35 = arith.addf %31, %34 : vector<16x384xf32>
    %36 = arith.truncf %35 : vector<16x384xf32> to vector<16x384xbf16>
    %37 = vector.extract_strided_slice %36 {offsets = [0, 0], sizes = [16, 128], strides = [1, 1]} : vector<16x384xbf16> to vector<16x128xbf16>
    %38 = vector.extract_strided_slice %36 {offsets = [0, 128], sizes = [16, 128], strides = [1, 1]} : vector<16x384xbf16> to vector<16x128xbf16>
    %39 = vector.extract_strided_slice %36 {offsets = [0, 256], sizes = [16, 128], strides = [1, 1]} : vector<16x384xbf16> to vector<16x128xbf16>
    %40 = vector.extract_strided_slice %37 {offsets = [0, 0], sizes = [16, 32], strides = [1, 1]} : vector<16x128xbf16> to vector<16x32xbf16>
    %41 = vector.extract_strided_slice %38 {offsets = [0, 0], sizes = [16, 32], strides = [1, 1]} : vector<16x128xbf16> to vector<16x32xbf16>
    %cst_18 = arith.constant dense<0.000000e+00> : vector<16x16xf32>
    %42 = tpu.matmul %40, %41, %cst_18 {dimension_numbers = #tpu.dot_dimension_numbers<[1], [1], [0], [0], [0, 0, 1, 0], [], []>} : vector<16x32xbf16>, vector<16x32xbf16>, vector<16x16xf32> -> vector<16x16xf32>
    %43 = arith.addf %42, %0 : vector<16x16xf32>
    %cst_19 = arith.constant dense<0xFF800000> : vector<16xf32>
    %44 = vector.multi_reduction <maximumf>, %43, %cst_19 [1] : vector<16x16xf32> to vector<16xf32>
    %45 = vector.shape_cast %44 : vector<16xf32> to vector<16x1xf32>
    %46 = vector.broadcast %45 : vector<16x1xf32> to vector<16x16xf32>
    %47 = arith.subf %43, %46 : vector<16x16xf32>
    %48 = math.exp %47 : vector<16x16xf32>
    %cst_20 = arith.constant dense<0.000000e+00> : vector<16xf32>
    %49 = vector.multi_reduction <add>, %48, %cst_20 [1] : vector<16x16xf32> to vector<16xf32>
    %50 = vector.shape_cast %49 : vector<16xf32> to vector<16x1xf32>
    %51 = tpu.reciprocal %50 {approx = true} : vector<16x1xf32> -> vector<16x1xf32>
    %52 = vector.broadcast %51 : vector<16x1xf32> to vector<16x16xf32>
    %53 = arith.mulf %48, %52 : vector<16x16xf32>
    %54 = arith.truncf %53 : vector<16x16xf32> to vector<16x16xbf16>
    %55 = vector.extract_strided_slice %39 {offsets = [0, 0], sizes = [16, 32], strides = [1, 1]} : vector<16x128xbf16> to vector<16x32xbf16>
    %cst_21 = arith.constant dense<0.000000e+00> : vector<16x32xf32>
    %56 = tpu.matmul %54, %55, %cst_21 {dimension_numbers = #tpu.dot_dimension_numbers<[1], [0], [0], [1], [0, 0, 1, 1], [], []>} : vector<16x16xbf16>, vector<16x32xbf16>, vector<16x32xf32> -> vector<16x32xf32>
    %57 = vector.extract_strided_slice %37 {offsets = [0, 32], sizes = [16, 32], strides = [1, 1]} : vector<16x128xbf16> to vector<16x32xbf16>
    %58 = vector.extract_strided_slice %38 {offsets = [0, 32], sizes = [16, 32], strides = [1, 1]} : vector<16x128xbf16> to vector<16x32xbf16>
    %cst_22 = arith.constant dense<0.000000e+00> : vector<16x16xf32>
    %59 = tpu.matmul %57, %58, %cst_22 {dimension_numbers = #tpu.dot_dimension_numbers<[1], [1], [0], [0], [0, 0, 1, 0], [], []>} : vector<16x32xbf16>, vector<16x32xbf16>, vector<16x16xf32> -> vector<16x16xf32>
    %60 = arith.addf %59, %0 : vector<16x16xf32>
    %cst_23 = arith.constant dense<0xFF800000> : vector<16xf32>
    %61 = vector.multi_reduction <maximumf>, %60, %cst_23 [1] : vector<16x16xf32> to vector<16xf32>
    %62 = vector.shape_cast %61 : vector<16xf32> to vector<16x1xf32>
    %63 = vector.broadcast %62 : vector<16x1xf32> to vector<16x16xf32>
    %64 = arith.subf %60, %63 : vector<16x16xf32>
    %65 = math.exp %64 : vector<16x16xf32>
    %cst_24 = arith.constant dense<0.000000e+00> : vector<16xf32>
    %66 = vector.multi_reduction <add>, %65, %cst_24 [1] : vector<16x16xf32> to vector<16xf32>
    %67 = vector.shape_cast %66 : vector<16xf32> to vector<16x1xf32>
    %68 = tpu.reciprocal %67 {approx = true} : vector<16x1xf32> -> vector<16x1xf32>
    %69 = vector.broadcast %68 : vector<16x1xf32> to vector<16x16xf32>
    %70 = arith.mulf %65, %69 : vector<16x16xf32>
    %71 = arith.truncf %70 : vector<16x16xf32> to vector<16x16xbf16>
    %72 = vector.extract_strided_slice %39 {offsets = [0, 32], sizes = [16, 32], strides = [1, 1]} : vector<16x128xbf16> to vector<16x32xbf16>
    %cst_25 = arith.constant dense<0.000000e+00> : vector<16x32xf32>
    %73 = tpu.matmul %71, %72, %cst_25 {dimension_numbers = #tpu.dot_dimension_numbers<[1], [0], [0], [1], [0, 0, 1, 1], [], []>} : vector<16x16xbf16>, vector<16x32xbf16>, vector<16x32xf32> -> vector<16x32xf32>
    %74 = vector.extract_strided_slice %37 {offsets = [0, 64], sizes = [16, 32], strides = [1, 1]} : vector<16x128xbf16> to vector<16x32xbf16>
    %75 = vector.extract_strided_slice %38 {offsets = [0, 64], sizes = [16, 32], strides = [1, 1]} : vector<16x128xbf16> to vector<16x32xbf16>
    %cst_26 = arith.constant dense<0.000000e+00> : vector<16x16xf32>
    %76 = tpu.matmul %74, %75, %cst_26 {dimension_numbers = #tpu.dot_dimension_numbers<[1], [1], [0], [0], [0, 0, 1, 0], [], []>} : vector<16x32xbf16>, vector<16x32xbf16>, vector<16x16xf32> -> vector<16x16xf32>
    %77 = arith.addf %76, %0 : vector<16x16xf32>
    %cst_27 = arith.constant dense<0xFF800000> : vector<16xf32>
    %78 = vector.multi_reduction <maximumf>, %77, %cst_27 [1] : vector<16x16xf32> to vector<16xf32>
    %79 = vector.shape_cast %78 : vector<16xf32> to vector<16x1xf32>
    %80 = vector.broadcast %79 : vector<16x1xf32> to vector<16x16xf32>
    %81 = arith.subf %77, %80 : vector<16x16xf32>
    %82 = math.exp %81 : vector<16x16xf32>
    %cst_28 = arith.constant dense<0.000000e+00> : vector<16xf32>
    %83 = vector.multi_reduction <add>, %82, %cst_28 [1] : vector<16x16xf32> to vector<16xf32>
    %84 = vector.shape_cast %83 : vector<16xf32> to vector<16x1xf32>
    %85 = tpu.reciprocal %84 {approx = true} : vector<16x1xf32> -> vector<16x1xf32>
    %86 = vector.broadcast %85 : vector<16x1xf32> to vector<16x16xf32>
    %87 = arith.mulf %82, %86 : vector<16x16xf32>
    %88 = arith.truncf %87 : vector<16x16xf32> to vector<16x16xbf16>
    %89 = vector.extract_strided_slice %39 {offsets = [0, 64], sizes = [16, 32], strides = [1, 1]} : vector<16x128xbf16> to vector<16x32xbf16>
    %cst_29 = arith.constant dense<0.000000e+00> : vector<16x32xf32>
    %90 = tpu.matmul %88, %89, %cst_29 {dimension_numbers = #tpu.dot_dimension_numbers<[1], [0], [0], [1], [0, 0, 1, 1], [], []>} : vector<16x16xbf16>, vector<16x32xbf16>, vector<16x32xf32> -> vector<16x32xf32>
    %91 = vector.extract_strided_slice %37 {offsets = [0, 96], sizes = [16, 32], strides = [1, 1]} : vector<16x128xbf16> to vector<16x32xbf16>
    %92 = vector.extract_strided_slice %38 {offsets = [0, 96], sizes = [16, 32], strides = [1, 1]} : vector<16x128xbf16> to vector<16x32xbf16>
    %cst_30 = arith.constant dense<0.000000e+00> : vector<16x16xf32>
    %93 = tpu.matmul %91, %92, %cst_30 {dimension_numbers = #tpu.dot_dimension_numbers<[1], [1], [0], [0], [0, 0, 1, 0], [], []>} : vector<16x32xbf16>, vector<16x32xbf16>, vector<16x16xf32> -> vector<16x16xf32>
    %94 = arith.addf %93, %0 : vector<16x16xf32>
    %cst_31 = arith.constant dense<0xFF800000> : vector<16xf32>
    %95 = vector.multi_reduction <maximumf>, %94, %cst_31 [1] : vector<16x16xf32> to vector<16xf32>
    %96 = vector.shape_cast %95 : vector<16xf32> to vector<16x1xf32>
    %97 = vector.broadcast %96 : vector<16x1xf32> to vector<16x16xf32>
    %98 = arith.subf %94, %97 : vector<16x16xf32>
    %99 = math.exp %98 : vector<16x16xf32>
    %cst_32 = arith.constant dense<0.000000e+00> : vector<16xf32>
    %100 = vector.multi_reduction <add>, %99, %cst_32 [1] : vector<16x16xf32> to vector<16xf32>
    %101 = vector.shape_cast %100 : vector<16xf32> to vector<16x1xf32>
    %102 = tpu.reciprocal %101 {approx = true} : vector<16x1xf32> -> vector<16x1xf32>
    %103 = vector.broadcast %102 : vector<16x1xf32> to vector<16x16xf32>
    %104 = arith.mulf %99, %103 : vector<16x16xf32>
    %105 = arith.truncf %104 : vector<16x16xf32> to vector<16x16xbf16>
    %106 = vector.extract_strided_slice %39 {offsets = [0, 96], sizes = [16, 32], strides = [1, 1]} : vector<16x128xbf16> to vector<16x32xbf16>
    %cst_33 = arith.constant dense<0.000000e+00> : vector<16x32xf32>
    %107 = tpu.matmul %105, %106, %cst_33 {dimension_numbers = #tpu.dot_dimension_numbers<[1], [0], [0], [1], [0, 0, 1, 1], [], []>} : vector<16x16xbf16>, vector<16x32xbf16>, vector<16x32xf32> -> vector<16x32xf32>
    %108 = tpu.concatenate %56, %73, %90, %107 in 1 : vector<16x32xf32>, vector<16x32xf32>, vector<16x32xf32>, vector<16x32xf32> -> vector<16x128xf32>
    %109 = arith.truncf %108 : vector<16x128xf32> to vector<16x128xbf16>
    %c0_34 = arith.constant 0 : index
    %c0_35 = arith.constant 0 : index
    %c0_36 = arith.constant 0 : index
    %110 = vector.load %arg6[%c0_34, %c0_35, %c0_36] : memref<2x128x128xbf16, #tpu.memory_space<vmem>>, vector<1x128x128xbf16>
    %111 = vector.shape_cast %110 : vector<1x128x128xbf16> to vector<128x128xbf16>
    %cst_37 = arith.constant dense<0.000000e+00> : vector<16x128xf32>
    %112 = tpu.matmul %109, %111, %cst_37 {dimension_numbers = #tpu.dot_dimension_numbers<[1], [0], [0], [1], [0, 0, 1, 1], [], []>} : vector<16x128xbf16>, vector<128x128xbf16>, vector<16x128xf32> -> vector<16x128xf32>
    %c0_38 = arith.constant 0 : index
    %c0_39 = arith.constant 0 : index
    %c0_40 = arith.constant 0 : index
    %113 = vector.load %arg7[%c0_38, %c0_39, %c0_40] : memref<2x1x128xf32, #tpu.memory_space<vmem>>, vector<1x1x128xf32>
    %114 = vector.shape_cast %113 : vector<1x1x128xf32> to vector<1x128xf32>
    %115 = vector.broadcast %114 : vector<1x128xf32> to vector<16x128xf32>
    %116 = arith.addf %112, %115 : vector<16x128xf32>
    %117 = arith.addf %27, %116 : vector<16x128xf32>
    %c0_41 = arith.constant 0 : index
    %c0_42 = arith.constant 0 : index
    %c0_43 = arith.constant 0 : index
    %118 = vector.load %arg8[%c0_41, %c0_42, %c0_43] : memref<2x1x128xf32, #tpu.memory_space<vmem>>, vector<1x1x128xf32>
    %119 = vector.shape_cast %118 : vector<1x1x128xf32> to vector<1x128xf32>
    %c0_44 = arith.constant 0 : index
    %c0_45 = arith.constant 0 : index
    %c0_46 = arith.constant 0 : index
    %120 = vector.load %arg9[%c0_44, %c0_45, %c0_46] : memref<2x1x128xf32, #tpu.memory_space<vmem>>, vector<1x1x128xf32>
    %121 = vector.shape_cast %120 : vector<1x1x128xf32> to vector<1x128xf32>
    %cst_47 = arith.constant dense<0.000000e+00> : vector<16xf32>
    %122 = vector.multi_reduction <add>, %117, %cst_47 [1] : vector<16x128xf32> to vector<16xf32>
    %123 = vector.shape_cast %122 : vector<16xf32> to vector<16x1xf32>
    %cst_48 = arith.constant 1.280000e+02 : f32
    %124 = vector.broadcast %cst_48 : f32 to vector<16x1xf32>
    %125 = arith.divf %123, %124 : vector<16x1xf32>
    %126 = vector.broadcast %125 : vector<16x1xf32> to vector<16x128xf32>
    %127 = arith.subf %117, %126 : vector<16x128xf32>
    %128 = vector.broadcast %125 : vector<16x1xf32> to vector<16x128xf32>
    %129 = arith.subf %117, %128 : vector<16x128xf32>
    %130 = arith.mulf %127, %129 : vector<16x128xf32>
    %cst_49 = arith.constant dense<0.000000e+00> : vector<16xf32>
    %131 = vector.multi_reduction <add>, %130, %cst_49 [1] : vector<16x128xf32> to vector<16xf32>
    %132 = vector.shape_cast %131 : vector<16xf32> to vector<16x1xf32>
    %cst_50 = arith.constant 1.280000e+02 : f32
    %133 = vector.broadcast %cst_50 : f32 to vector<16x1xf32>
    %134 = arith.divf %132, %133 : vector<16x1xf32>
    %135 = vector.broadcast %125 : vector<16x1xf32> to vector<16x128xf32>
    %136 = arith.subf %117, %135 : vector<16x128xf32>
    %cst_51 = arith.constant 9.99999996E-13 : f32
    %137 = vector.broadcast %cst_51 : f32 to vector<16x1xf32>
    %138 = arith.addf %134, %137 : vector<16x1xf32>
    %139 = math.rsqrt %138 : vector<16x1xf32>
    %140 = vector.broadcast %139 : vector<16x1xf32> to vector<16x128xf32>
    %141 = arith.mulf %136, %140 : vector<16x128xf32>
    %142 = vector.broadcast %119 : vector<1x128xf32> to vector<16x128xf32>
    %143 = arith.mulf %141, %142 : vector<16x128xf32>
    %144 = vector.broadcast %121 : vector<1x128xf32> to vector<16x128xf32>
    %145 = arith.addf %143, %144 : vector<16x128xf32>
    %146 = arith.truncf %145 : vector<16x128xf32> to vector<16x128xbf16>
    %c0_52 = arith.constant 0 : index
    %c0_53 = arith.constant 0 : index
    %c0_54 = arith.constant 0 : index
    %147 = vector.load %arg10[%c0_52, %c0_53, %c0_54] : memref<2x128x256xbf16, #tpu.memory_space<vmem>>, vector<1x128x256xbf16>
    %148 = vector.shape_cast %147 : vector<1x128x256xbf16> to vector<128x256xbf16>
    %cst_55 = arith.constant dense<0.000000e+00> : vector<16x256xf32>
    %149 = tpu.matmul %146, %148, %cst_55 {dimension_numbers = #tpu.dot_dimension_numbers<[1], [0], [0], [1], [0, 0, 1, 1], [], []>} : vector<16x128xbf16>, vector<128x256xbf16>, vector<16x256xf32> -> vector<16x256xf32>
    %c0_56 = arith.constant 0 : index
    %c0_57 = arith.constant 0 : index
    %c0_58 = arith.constant 0 : index
    %150 = vector.load %arg11[%c0_56, %c0_57, %c0_58] : memref<2x1x256xf32, #tpu.memory_space<vmem>>, vector<1x1x256xf32>
    %151 = vector.shape_cast %150 : vector<1x1x256xf32> to vector<1x256xf32>
    %152 = vector.broadcast %151 : vector<1x256xf32> to vector<16x256xf32>
    %153 = arith.addf %149, %152 : vector<16x256xf32>
    %154 = arith.mulf %153, %153 : vector<16x256xf32>
    %155 = arith.mulf %153, %154 : vector<16x256xf32>
    %cst_59 = arith.constant 4.471500e-02 : f32
    %156 = vector.broadcast %cst_59 : f32 to vector<16x256xf32>
    %157 = arith.mulf %156, %155 : vector<16x256xf32>
    %158 = arith.addf %153, %157 : vector<16x256xf32>
    %cst_60 = arith.constant 0.797884583 : f32
    %159 = vector.broadcast %cst_60 : f32 to vector<16x256xf32>
    %160 = arith.mulf %159, %158 : vector<16x256xf32>
    %161 = math.tanh %160 : vector<16x256xf32>
    %cst_61 = arith.constant 1.000000e+00 : f32
    %162 = vector.broadcast %cst_61 : f32 to vector<16x256xf32>
    %163 = arith.addf %162, %161 : vector<16x256xf32>
    %cst_62 = arith.constant 5.000000e-01 : f32
    %164 = vector.broadcast %cst_62 : f32 to vector<16x256xf32>
    %165 = arith.mulf %164, %163 : vector<16x256xf32>
    %166 = arith.mulf %153, %165 : vector<16x256xf32>
    %167 = arith.truncf %166 : vector<16x256xf32> to vector<16x256xbf16>
    %c0_63 = arith.constant 0 : index
    %c0_64 = arith.constant 0 : index
    %c0_65 = arith.constant 0 : index
    %168 = vector.load %arg12[%c0_63, %c0_64, %c0_65] : memref<2x256x128xbf16, #tpu.memory_space<vmem>>, vector<1x256x128xbf16>
    %169 = vector.shape_cast %168 : vector<1x256x128xbf16> to vector<256x128xbf16>
    %cst_66 = arith.constant dense<0.000000e+00> : vector<16x128xf32>
    %170 = tpu.matmul %167, %169, %cst_66 {dimension_numbers = #tpu.dot_dimension_numbers<[1], [0], [0], [1], [0, 0, 1, 1], [], []>} : vector<16x256xbf16>, vector<256x128xbf16>, vector<16x128xf32> -> vector<16x128xf32>
    %c0_67 = arith.constant 0 : index
    %c0_68 = arith.constant 0 : index
    %c0_69 = arith.constant 0 : index
    %171 = vector.load %arg13[%c0_67, %c0_68, %c0_69] : memref<2x1x128xf32, #tpu.memory_space<vmem>>, vector<1x1x128xf32>
    %172 = vector.shape_cast %171 : vector<1x1x128xf32> to vector<1x128xf32>
    %173 = vector.broadcast %172 : vector<1x128xf32> to vector<16x128xf32>
    %174 = arith.addf %170, %173 : vector<16x128xf32>
    %175 = arith.addf %145, %174 : vector<16x128xf32>
    %c0_70 = arith.constant 0 : index
    %c0_71 = arith.constant 0 : index
    %c0_72 = arith.constant 0 : index
    %176 = vector.load %arg14[%c0_70, %c0_71, %c0_72] : memref<2x1x128xf32, #tpu.memory_space<vmem>>, vector<1x1x128xf32>
    %177 = vector.shape_cast %176 : vector<1x1x128xf32> to vector<1x128xf32>
    %c0_73 = arith.constant 0 : index
    %c0_74 = arith.constant 0 : index
    %c0_75 = arith.constant 0 : index
    %178 = vector.load %arg15[%c0_73, %c0_74, %c0_75] : memref<2x1x128xf32, #tpu.memory_space<vmem>>, vector<1x1x128xf32>
    %179 = vector.shape_cast %178 : vector<1x1x128xf32> to vector<1x128xf32>
    %cst_76 = arith.constant dense<0.000000e+00> : vector<16xf32>
    %180 = vector.multi_reduction <add>, %175, %cst_76 [1] : vector<16x128xf32> to vector<16xf32>
    %181 = vector.shape_cast %180 : vector<16xf32> to vector<16x1xf32>
    %cst_77 = arith.constant 1.280000e+02 : f32
    %182 = vector.broadcast %cst_77 : f32 to vector<16x1xf32>
    %183 = arith.divf %181, %182 : vector<16x1xf32>
    %184 = vector.broadcast %183 : vector<16x1xf32> to vector<16x128xf32>
    %185 = arith.subf %175, %184 : vector<16x128xf32>
    %186 = vector.broadcast %183 : vector<16x1xf32> to vector<16x128xf32>
    %187 = arith.subf %175, %186 : vector<16x128xf32>
    %188 = arith.mulf %185, %187 : vector<16x128xf32>
    %cst_78 = arith.constant dense<0.000000e+00> : vector<16xf32>
    %189 = vector.multi_reduction <add>, %188, %cst_78 [1] : vector<16x128xf32> to vector<16xf32>
    %190 = vector.shape_cast %189 : vector<16xf32> to vector<16x1xf32>
    %cst_79 = arith.constant 1.280000e+02 : f32
    %191 = vector.broadcast %cst_79 : f32 to vector<16x1xf32>
    %192 = arith.divf %190, %191 : vector<16x1xf32>
    %193 = vector.broadcast %183 : vector<16x1xf32> to vector<16x128xf32>
    %194 = arith.subf %175, %193 : vector<16x128xf32>
    %cst_80 = arith.constant 9.99999996E-13 : f32
    %195 = vector.broadcast %cst_80 : f32 to vector<16x1xf32>
    %196 = arith.addf %192, %195 : vector<16x1xf32>
    %197 = math.rsqrt %196 : vector<16x1xf32>
    %198 = vector.broadcast %197 : vector<16x1xf32> to vector<16x128xf32>
    %199 = arith.mulf %194, %198 : vector<16x128xf32>
    %200 = vector.broadcast %177 : vector<1x128xf32> to vector<16x128xf32>
    %201 = arith.mulf %199, %200 : vector<16x128xf32>
    %202 = vector.broadcast %179 : vector<1x128xf32> to vector<16x128xf32>
    %203 = arith.addf %201, %202 : vector<16x128xf32>
    %204 = arith.truncf %203 : vector<16x128xf32> to vector<16x128xbf16>
    %c1 = arith.constant 1 : index
    %c0_81 = arith.constant 0 : index
    %c0_82 = arith.constant 0 : index
    %205 = vector.load %arg4[%c1, %c0_81, %c0_82] : memref<2x128x384xbf16, #tpu.memory_space<vmem>>, vector<1x128x384xbf16>
    %206 = vector.shape_cast %205 : vector<1x128x384xbf16> to vector<128x384xbf16>
    %cst_83 = arith.constant dense<0.000000e+00> : vector<16x384xf32>
    %207 = tpu.matmul %204, %206, %cst_83 {dimension_numbers = #tpu.dot_dimension_numbers<[1], [0], [0], [1], [0, 0, 1, 1], [], []>} : vector<16x128xbf16>, vector<128x384xbf16>, vector<16x384xf32> -> vector<16x384xf32>
    %c1_84 = arith.constant 1 : index
    %c0_85 = arith.constant 0 : index
    %c0_86 = arith.constant 0 : index
    %208 = vector.load %arg5[%c1_84, %c0_85, %c0_86] : memref<2x1x384xf32, #tpu.memory_space<vmem>>, vector<1x1x384xf32>
    %209 = vector.shape_cast %208 : vector<1x1x384xf32> to vector<1x384xf32>
    %210 = vector.broadcast %209 : vector<1x384xf32> to vector<16x384xf32>
    %211 = arith.addf %207, %210 : vector<16x384xf32>
    %212 = arith.truncf %211 : vector<16x384xf32> to vector<16x384xbf16>
    %213 = vector.extract_strided_slice %212 {offsets = [0, 0], sizes = [16, 128], strides = [1, 1]} : vector<16x384xbf16> to vector<16x128xbf16>
    %214 = vector.extract_strided_slice %212 {offsets = [0, 128], sizes = [16, 128], strides = [1, 1]} : vector<16x384xbf16> to vector<16x128xbf16>
    %215 = vector.extract_strided_slice %212 {offsets = [0, 256], sizes = [16, 128], strides = [1, 1]} : vector<16x384xbf16> to vector<16x128xbf16>
    %216 = vector.extract_strided_slice %213 {offsets = [0, 0], sizes = [16, 32], strides = [1, 1]} : vector<16x128xbf16> to vector<16x32xbf16>
    %217 = vector.extract_strided_slice %214 {offsets = [0, 0], sizes = [16, 32], strides = [1, 1]} : vector<16x128xbf16> to vector<16x32xbf16>
    %cst_87 = arith.constant dense<0.000000e+00> : vector<16x16xf32>
    %218 = tpu.matmul %216, %217, %cst_87 {dimension_numbers = #tpu.dot_dimension_numbers<[1], [1], [0], [0], [0, 0, 1, 0], [], []>} : vector<16x32xbf16>, vector<16x32xbf16>, vector<16x16xf32> -> vector<16x16xf32>
    %219 = arith.addf %218, %0 : vector<16x16xf32>
    %cst_88 = arith.constant dense<0xFF800000> : vector<16xf32>
    %220 = vector.multi_reduction <maximumf>, %219, %cst_88 [1] : vector<16x16xf32> to vector<16xf32>
    %221 = vector.shape_cast %220 : vector<16xf32> to vector<16x1xf32>
    %222 = vector.broadcast %221 : vector<16x1xf32> to vector<16x16xf32>
    %223 = arith.subf %219, %222 : vector<16x16xf32>
    %224 = math.exp %223 : vector<16x16xf32>
    %cst_89 = arith.constant dense<0.000000e+00> : vector<16xf32>
    %225 = vector.multi_reduction <add>, %224, %cst_89 [1] : vector<16x16xf32> to vector<16xf32>
    %226 = vector.shape_cast %225 : vector<16xf32> to vector<16x1xf32>
    %227 = tpu.reciprocal %226 {approx = true} : vector<16x1xf32> -> vector<16x1xf32>
    %228 = vector.broadcast %227 : vector<16x1xf32> to vector<16x16xf32>
    %229 = arith.mulf %224, %228 : vector<16x16xf32>
    %230 = arith.truncf %229 : vector<16x16xf32> to vector<16x16xbf16>
    %231 = vector.extract_strided_slice %215 {offsets = [0, 0], sizes = [16, 32], strides = [1, 1]} : vector<16x128xbf16> to vector<16x32xbf16>
    %cst_90 = arith.constant dense<0.000000e+00> : vector<16x32xf32>
    %232 = tpu.matmul %230, %231, %cst_90 {dimension_numbers = #tpu.dot_dimension_numbers<[1], [0], [0], [1], [0, 0, 1, 1], [], []>} : vector<16x16xbf16>, vector<16x32xbf16>, vector<16x32xf32> -> vector<16x32xf32>
    %233 = vector.extract_strided_slice %213 {offsets = [0, 32], sizes = [16, 32], strides = [1, 1]} : vector<16x128xbf16> to vector<16x32xbf16>
    %234 = vector.extract_strided_slice %214 {offsets = [0, 32], sizes = [16, 32], strides = [1, 1]} : vector<16x128xbf16> to vector<16x32xbf16>
    %cst_91 = arith.constant dense<0.000000e+00> : vector<16x16xf32>
    %235 = tpu.matmul %233, %234, %cst_91 {dimension_numbers = #tpu.dot_dimension_numbers<[1], [1], [0], [0], [0, 0, 1, 0], [], []>} : vector<16x32xbf16>, vector<16x32xbf16>, vector<16x16xf32> -> vector<16x16xf32>
    %236 = arith.addf %235, %0 : vector<16x16xf32>
    %cst_92 = arith.constant dense<0xFF800000> : vector<16xf32>
    %237 = vector.multi_reduction <maximumf>, %236, %cst_92 [1] : vector<16x16xf32> to vector<16xf32>
    %238 = vector.shape_cast %237 : vector<16xf32> to vector<16x1xf32>
    %239 = vector.broadcast %238 : vector<16x1xf32> to vector<16x16xf32>
    %240 = arith.subf %236, %239 : vector<16x16xf32>
    %241 = math.exp %240 : vector<16x16xf32>
    %cst_93 = arith.constant dense<0.000000e+00> : vector<16xf32>
    %242 = vector.multi_reduction <add>, %241, %cst_93 [1] : vector<16x16xf32> to vector<16xf32>
    %243 = vector.shape_cast %242 : vector<16xf32> to vector<16x1xf32>
    %244 = tpu.reciprocal %243 {approx = true} : vector<16x1xf32> -> vector<16x1xf32>
    %245 = vector.broadcast %244 : vector<16x1xf32> to vector<16x16xf32>
    %246 = arith.mulf %241, %245 : vector<16x16xf32>
    %247 = arith.truncf %246 : vector<16x16xf32> to vector<16x16xbf16>
    %248 = vector.extract_strided_slice %215 {offsets = [0, 32], sizes = [16, 32], strides = [1, 1]} : vector<16x128xbf16> to vector<16x32xbf16>
    %cst_94 = arith.constant dense<0.000000e+00> : vector<16x32xf32>
    %249 = tpu.matmul %247, %248, %cst_94 {dimension_numbers = #tpu.dot_dimension_numbers<[1], [0], [0], [1], [0, 0, 1, 1], [], []>} : vector<16x16xbf16>, vector<16x32xbf16>, vector<16x32xf32> -> vector<16x32xf32>
    %250 = vector.extract_strided_slice %213 {offsets = [0, 64], sizes = [16, 32], strides = [1, 1]} : vector<16x128xbf16> to vector<16x32xbf16>
    %251 = vector.extract_strided_slice %214 {offsets = [0, 64], sizes = [16, 32], strides = [1, 1]} : vector<16x128xbf16> to vector<16x32xbf16>
    %cst_95 = arith.constant dense<0.000000e+00> : vector<16x16xf32>
    %252 = tpu.matmul %250, %251, %cst_95 {dimension_numbers = #tpu.dot_dimension_numbers<[1], [1], [0], [0], [0, 0, 1, 0], [], []>} : vector<16x32xbf16>, vector<16x32xbf16>, vector<16x16xf32> -> vector<16x16xf32>
    %253 = arith.addf %252, %0 : vector<16x16xf32>
    %cst_96 = arith.constant dense<0xFF800000> : vector<16xf32>
    %254 = vector.multi_reduction <maximumf>, %253, %cst_96 [1] : vector<16x16xf32> to vector<16xf32>
    %255 = vector.shape_cast %254 : vector<16xf32> to vector<16x1xf32>
    %256 = vector.broadcast %255 : vector<16x1xf32> to vector<16x16xf32>
    %257 = arith.subf %253, %256 : vector<16x16xf32>
    %258 = math.exp %257 : vector<16x16xf32>
    %cst_97 = arith.constant dense<0.000000e+00> : vector<16xf32>
    %259 = vector.multi_reduction <add>, %258, %cst_97 [1] : vector<16x16xf32> to vector<16xf32>
    %260 = vector.shape_cast %259 : vector<16xf32> to vector<16x1xf32>
    %261 = tpu.reciprocal %260 {approx = true} : vector<16x1xf32> -> vector<16x1xf32>
    %262 = vector.broadcast %261 : vector<16x1xf32> to vector<16x16xf32>
    %263 = arith.mulf %258, %262 : vector<16x16xf32>
    %264 = arith.truncf %263 : vector<16x16xf32> to vector<16x16xbf16>
    %265 = vector.extract_strided_slice %215 {offsets = [0, 64], sizes = [16, 32], strides = [1, 1]} : vector<16x128xbf16> to vector<16x32xbf16>
    %cst_98 = arith.constant dense<0.000000e+00> : vector<16x32xf32>
    %266 = tpu.matmul %264, %265, %cst_98 {dimension_numbers = #tpu.dot_dimension_numbers<[1], [0], [0], [1], [0, 0, 1, 1], [], []>} : vector<16x16xbf16>, vector<16x32xbf16>, vector<16x32xf32> -> vector<16x32xf32>
    %267 = vector.extract_strided_slice %213 {offsets = [0, 96], sizes = [16, 32], strides = [1, 1]} : vector<16x128xbf16> to vector<16x32xbf16>
    %268 = vector.extract_strided_slice %214 {offsets = [0, 96], sizes = [16, 32], strides = [1, 1]} : vector<16x128xbf16> to vector<16x32xbf16>
    %cst_99 = arith.constant dense<0.000000e+00> : vector<16x16xf32>
    %269 = tpu.matmul %267, %268, %cst_99 {dimension_numbers = #tpu.dot_dimension_numbers<[1], [1], [0], [0], [0, 0, 1, 0], [], []>} : vector<16x32xbf16>, vector<16x32xbf16>, vector<16x16xf32> -> vector<16x16xf32>
    %270 = arith.addf %269, %0 : vector<16x16xf32>
    %cst_100 = arith.constant dense<0xFF800000> : vector<16xf32>
    %271 = vector.multi_reduction <maximumf>, %270, %cst_100 [1] : vector<16x16xf32> to vector<16xf32>
    %272 = vector.shape_cast %271 : vector<16xf32> to vector<16x1xf32>
    %273 = vector.broadcast %272 : vector<16x1xf32> to vector<16x16xf32>
    %274 = arith.subf %270, %273 : vector<16x16xf32>
    %275 = math.exp %274 : vector<16x16xf32>
    %cst_101 = arith.constant dense<0.000000e+00> : vector<16xf32>
    %276 = vector.multi_reduction <add>, %275, %cst_101 [1] : vector<16x16xf32> to vector<16xf32>
    %277 = vector.shape_cast %276 : vector<16xf32> to vector<16x1xf32>
    %278 = tpu.reciprocal %277 {approx = true} : vector<16x1xf32> -> vector<16x1xf32>
    %279 = vector.broadcast %278 : vector<16x1xf32> to vector<16x16xf32>
    %280 = arith.mulf %275, %279 : vector<16x16xf32>
    %281 = arith.truncf %280 : vector<16x16xf32> to vector<16x16xbf16>
    %282 = vector.extract_strided_slice %215 {offsets = [0, 96], sizes = [16, 32], strides = [1, 1]} : vector<16x128xbf16> to vector<16x32xbf16>
    %cst_102 = arith.constant dense<0.000000e+00> : vector<16x32xf32>
    %283 = tpu.matmul %281, %282, %cst_102 {dimension_numbers = #tpu.dot_dimension_numbers<[1], [0], [0], [1], [0, 0, 1, 1], [], []>} : vector<16x16xbf16>, vector<16x32xbf16>, vector<16x32xf32> -> vector<16x32xf32>
    %284 = tpu.concatenate %232, %249, %266, %283 in 1 : vector<16x32xf32>, vector<16x32xf32>, vector<16x32xf32>, vector<16x32xf32> -> vector<16x128xf32>
    %285 = arith.truncf %284 : vector<16x128xf32> to vector<16x128xbf16>
    %c1_103 = arith.constant 1 : index
    %c0_104 = arith.constant 0 : index
    %c0_105 = arith.constant 0 : index
    %286 = vector.load %arg6[%c1_103, %c0_104, %c0_105] : memref<2x128x128xbf16, #tpu.memory_space<vmem>>, vector<1x128x128xbf16>
    %287 = vector.shape_cast %286 : vector<1x128x128xbf16> to vector<128x128xbf16>
    %cst_106 = arith.constant dense<0.000000e+00> : vector<16x128xf32>
    %288 = tpu.matmul %285, %287, %cst_106 {dimension_numbers = #tpu.dot_dimension_numbers<[1], [0], [0], [1], [0, 0, 1, 1], [], []>} : vector<16x128xbf16>, vector<128x128xbf16>, vector<16x128xf32> -> vector<16x128xf32>
    %c1_107 = arith.constant 1 : index
    %c0_108 = arith.constant 0 : index
    %c0_109 = arith.constant 0 : index
    %289 = vector.load %arg7[%c1_107, %c0_108, %c0_109] : memref<2x1x128xf32, #tpu.memory_space<vmem>>, vector<1x1x128xf32>
    %290 = vector.shape_cast %289 : vector<1x1x128xf32> to vector<1x128xf32>
    %291 = vector.broadcast %290 : vector<1x128xf32> to vector<16x128xf32>
    %292 = arith.addf %288, %291 : vector<16x128xf32>
    %293 = arith.addf %203, %292 : vector<16x128xf32>
    %c1_110 = arith.constant 1 : index
    %c0_111 = arith.constant 0 : index
    %c0_112 = arith.constant 0 : index
    %294 = vector.load %arg8[%c1_110, %c0_111, %c0_112] : memref<2x1x128xf32, #tpu.memory_space<vmem>>, vector<1x1x128xf32>
    %295 = vector.shape_cast %294 : vector<1x1x128xf32> to vector<1x128xf32>
    %c1_113 = arith.constant 1 : index
    %c0_114 = arith.constant 0 : index
    %c0_115 = arith.constant 0 : index
    %296 = vector.load %arg9[%c1_113, %c0_114, %c0_115] : memref<2x1x128xf32, #tpu.memory_space<vmem>>, vector<1x1x128xf32>
    %297 = vector.shape_cast %296 : vector<1x1x128xf32> to vector<1x128xf32>
    %cst_116 = arith.constant dense<0.000000e+00> : vector<16xf32>
    %298 = vector.multi_reduction <add>, %293, %cst_116 [1] : vector<16x128xf32> to vector<16xf32>
    %299 = vector.shape_cast %298 : vector<16xf32> to vector<16x1xf32>
    %cst_117 = arith.constant 1.280000e+02 : f32
    %300 = vector.broadcast %cst_117 : f32 to vector<16x1xf32>
    %301 = arith.divf %299, %300 : vector<16x1xf32>
    %302 = vector.broadcast %301 : vector<16x1xf32> to vector<16x128xf32>
    %303 = arith.subf %293, %302 : vector<16x128xf32>
    %304 = vector.broadcast %301 : vector<16x1xf32> to vector<16x128xf32>
    %305 = arith.subf %293, %304 : vector<16x128xf32>
    %306 = arith.mulf %303, %305 : vector<16x128xf32>
    %cst_118 = arith.constant dense<0.000000e+00> : vector<16xf32>
    %307 = vector.multi_reduction <add>, %306, %cst_118 [1] : vector<16x128xf32> to vector<16xf32>
    %308 = vector.shape_cast %307 : vector<16xf32> to vector<16x1xf32>
    %cst_119 = arith.constant 1.280000e+02 : f32
    %309 = vector.broadcast %cst_119 : f32 to vector<16x1xf32>
    %310 = arith.divf %308, %309 : vector<16x1xf32>
    %311 = vector.broadcast %301 : vector<16x1xf32> to vector<16x128xf32>
    %312 = arith.subf %293, %311 : vector<16x128xf32>
    %cst_120 = arith.constant 9.99999996E-13 : f32
    %313 = vector.broadcast %cst_120 : f32 to vector<16x1xf32>
    %314 = arith.addf %310, %313 : vector<16x1xf32>
    %315 = math.rsqrt %314 : vector<16x1xf32>
    %316 = vector.broadcast %315 : vector<16x1xf32> to vector<16x128xf32>
    %317 = arith.mulf %312, %316 : vector<16x128xf32>
    %318 = vector.broadcast %295 : vector<1x128xf32> to vector<16x128xf32>
    %319 = arith.mulf %317, %318 : vector<16x128xf32>
    %320 = vector.broadcast %297 : vector<1x128xf32> to vector<16x128xf32>
    %321 = arith.addf %319, %320 : vector<16x128xf32>
    %322 = arith.truncf %321 : vector<16x128xf32> to vector<16x128xbf16>
    %c1_121 = arith.constant 1 : index
    %c0_122 = arith.constant 0 : index
    %c0_123 = arith.constant 0 : index
    %323 = vector.load %arg10[%c1_121, %c0_122, %c0_123] : memref<2x128x256xbf16, #tpu.memory_space<vmem>>, vector<1x128x256xbf16>
    %324 = vector.shape_cast %323 : vector<1x128x256xbf16> to vector<128x256xbf16>
    %cst_124 = arith.constant dense<0.000000e+00> : vector<16x256xf32>
    %325 = tpu.matmul %322, %324, %cst_124 {dimension_numbers = #tpu.dot_dimension_numbers<[1], [0], [0], [1], [0, 0, 1, 1], [], []>} : vector<16x128xbf16>, vector<128x256xbf16>, vector<16x256xf32> -> vector<16x256xf32>
    %c1_125 = arith.constant 1 : index
    %c0_126 = arith.constant 0 : index
    %c0_127 = arith.constant 0 : index
    %326 = vector.load %arg11[%c1_125, %c0_126, %c0_127] : memref<2x1x256xf32, #tpu.memory_space<vmem>>, vector<1x1x256xf32>
    %327 = vector.shape_cast %326 : vector<1x1x256xf32> to vector<1x256xf32>
    %328 = vector.broadcast %327 : vector<1x256xf32> to vector<16x256xf32>
    %329 = arith.addf %325, %328 : vector<16x256xf32>
    %330 = arith.mulf %329, %329 : vector<16x256xf32>
    %331 = arith.mulf %329, %330 : vector<16x256xf32>
    %cst_128 = arith.constant 4.471500e-02 : f32
    %332 = vector.broadcast %cst_128 : f32 to vector<16x256xf32>
    %333 = arith.mulf %332, %331 : vector<16x256xf32>
    %334 = arith.addf %329, %333 : vector<16x256xf32>
    %cst_129 = arith.constant 0.797884583 : f32
    %335 = vector.broadcast %cst_129 : f32 to vector<16x256xf32>
    %336 = arith.mulf %335, %334 : vector<16x256xf32>
    %337 = math.tanh %336 : vector<16x256xf32>
    %cst_130 = arith.constant 1.000000e+00 : f32
    %338 = vector.broadcast %cst_130 : f32 to vector<16x256xf32>
    %339 = arith.addf %338, %337 : vector<16x256xf32>
    %cst_131 = arith.constant 5.000000e-01 : f32
    %340 = vector.broadcast %cst_131 : f32 to vector<16x256xf32>
    %341 = arith.mulf %340, %339 : vector<16x256xf32>
    %342 = arith.mulf %329, %341 : vector<16x256xf32>
    %343 = arith.truncf %342 : vector<16x256xf32> to vector<16x256xbf16>
    %c1_132 = arith.constant 1 : index
    %c0_133 = arith.constant 0 : index
    %c0_134 = arith.constant 0 : index
    %344 = vector.load %arg12[%c1_132, %c0_133, %c0_134] : memref<2x256x128xbf16, #tpu.memory_space<vmem>>, vector<1x256x128xbf16>
    %345 = vector.shape_cast %344 : vector<1x256x128xbf16> to vector<256x128xbf16>
    %cst_135 = arith.constant dense<0.000000e+00> : vector<16x128xf32>
    %346 = tpu.matmul %343, %345, %cst_135 {dimension_numbers = #tpu.dot_dimension_numbers<[1], [0], [0], [1], [0, 0, 1, 1], [], []>} : vector<16x256xbf16>, vector<256x128xbf16>, vector<16x128xf32> -> vector<16x128xf32>
    %c1_136 = arith.constant 1 : index
    %c0_137 = arith.constant 0 : index
    %c0_138 = arith.constant 0 : index
    %347 = vector.load %arg13[%c1_136, %c0_137, %c0_138] : memref<2x1x128xf32, #tpu.memory_space<vmem>>, vector<1x1x128xf32>
    %348 = vector.shape_cast %347 : vector<1x1x128xf32> to vector<1x128xf32>
    %349 = vector.broadcast %348 : vector<1x128xf32> to vector<16x128xf32>
    %350 = arith.addf %346, %349 : vector<16x128xf32>
    %351 = arith.addf %321, %350 : vector<16x128xf32>
    %c1_139 = arith.constant 1 : index
    %c0_140 = arith.constant 0 : index
    %c0_141 = arith.constant 0 : index
    %352 = vector.load %arg14[%c1_139, %c0_140, %c0_141] : memref<2x1x128xf32, #tpu.memory_space<vmem>>, vector<1x1x128xf32>
    %353 = vector.shape_cast %352 : vector<1x1x128xf32> to vector<1x128xf32>
    %c1_142 = arith.constant 1 : index
    %c0_143 = arith.constant 0 : index
    %c0_144 = arith.constant 0 : index
    %354 = vector.load %arg15[%c1_142, %c0_143, %c0_144] : memref<2x1x128xf32, #tpu.memory_space<vmem>>, vector<1x1x128xf32>
    %355 = vector.shape_cast %354 : vector<1x1x128xf32> to vector<1x128xf32>
    %cst_145 = arith.constant dense<0.000000e+00> : vector<16xf32>
    %356 = vector.multi_reduction <add>, %351, %cst_145 [1] : vector<16x128xf32> to vector<16xf32>
    %357 = vector.shape_cast %356 : vector<16xf32> to vector<16x1xf32>
    %cst_146 = arith.constant 1.280000e+02 : f32
    %358 = vector.broadcast %cst_146 : f32 to vector<16x1xf32>
    %359 = arith.divf %357, %358 : vector<16x1xf32>
    %360 = vector.broadcast %359 : vector<16x1xf32> to vector<16x128xf32>
    %361 = arith.subf %351, %360 : vector<16x128xf32>
    %362 = vector.broadcast %359 : vector<16x1xf32> to vector<16x128xf32>
    %363 = arith.subf %351, %362 : vector<16x128xf32>
    %364 = arith.mulf %361, %363 : vector<16x128xf32>
    %cst_147 = arith.constant dense<0.000000e+00> : vector<16xf32>
    %365 = vector.multi_reduction <add>, %364, %cst_147 [1] : vector<16x128xf32> to vector<16xf32>
    %366 = vector.shape_cast %365 : vector<16xf32> to vector<16x1xf32>
    %cst_148 = arith.constant 1.280000e+02 : f32
    %367 = vector.broadcast %cst_148 : f32 to vector<16x1xf32>
    %368 = arith.divf %366, %367 : vector<16x1xf32>
    %369 = vector.broadcast %359 : vector<16x1xf32> to vector<16x128xf32>
    %370 = arith.subf %351, %369 : vector<16x128xf32>
    %cst_149 = arith.constant 9.99999996E-13 : f32
    %371 = vector.broadcast %cst_149 : f32 to vector<16x1xf32>
    %372 = arith.addf %368, %371 : vector<16x1xf32>
    %373 = math.rsqrt %372 : vector<16x1xf32>
    %374 = vector.broadcast %373 : vector<16x1xf32> to vector<16x128xf32>
    %375 = arith.mulf %370, %374 : vector<16x128xf32>
    %376 = vector.broadcast %353 : vector<1x128xf32> to vector<16x128xf32>
    %377 = arith.mulf %375, %376 : vector<16x128xf32>
    %378 = vector.broadcast %355 : vector<1x128xf32> to vector<16x128xf32>
    %379 = arith.addf %377, %378 : vector<16x128xf32>
    %c0_150 = arith.constant 0 : index
    %c0_151 = arith.constant 0 : index
    %380 = vector.load %arg21[%c0_150, %c0_151] : memref<16x128xf32, #tpu.memory_space<vmem>>, vector<16x128xf32>
    tpu.vector_store %arg21[%c0_150, %c0_151], %379 {strides = array<i32>} : memref<16x128xf32, #tpu.memory_space<vmem>>, vector<16x128xf32>,
    %c0_152 = arith.constant 0 : index
    %c0_153 = arith.constant 0 : index
    %381 = tpu.strided_load %arg21[%c0_152, %c0_153] {strides = array<i32: 8, 1>} : memref<16x128xf32, #tpu.memory_space<vmem>>, vector<2x128xf32>
    %382 = arith.truncf %381 : vector<2x128xf32> to vector<2x128xbf16>
    %c0_154 = arith.constant 0 : index
    %c0_155 = arith.constant 0 : index
    %383 = vector.load %arg16[%c0_154, %c0_155] : memref<128x128xbf16, #tpu.memory_space<vmem>>, vector<128x128xbf16>
    %cst_156 = arith.constant dense<0.000000e+00> : vector<2x128xf32>
    %384 = tpu.matmul %382, %383, %cst_156 {dimension_numbers = #tpu.dot_dimension_numbers<[1], [0], [0], [1], [0, 0, 1, 1], [], []>} : vector<2x128xbf16>, vector<128x128xbf16>, vector<2x128xf32> -> vector<2x128xf32>
    %c0_157 = arith.constant 0 : index
    %c0_158 = arith.constant 0 : index
    %385 = vector.load %arg17[%c0_157, %c0_158] : memref<1x128xf32, #tpu.memory_space<vmem>>, vector<1x128xf32>
    %386 = vector.broadcast %385 : vector<1x128xf32> to vector<2x128xf32>
    %387 = arith.addf %384, %386 : vector<2x128xf32>
    %388 = math.tanh %387 : vector<2x128xf32>
    %389 = arith.truncf %388 : vector<2x128xf32> to vector<2x128xbf16>
    %c0_159 = arith.constant 0 : index
    %c0_160 = arith.constant 0 : index
    %390 = vector.load %arg18[%c0_159, %c0_160] : memref<128x128xbf16, #tpu.memory_space<vmem>>, vector<128x128xbf16>
    %cst_161 = arith.constant dense<0.000000e+00> : vector<2x128xf32>
    %391 = tpu.matmul %389, %390, %cst_161 {dimension_numbers = #tpu.dot_dimension_numbers<[1], [0], [0], [1], [0, 0, 1, 1], [], []>} : vector<2x128xbf16>, vector<128x128xbf16>, vector<2x128xf32> -> vector<2x128xf32>
    %c0_162 = arith.constant 0 : index
    %c0_163 = arith.constant 0 : index
    %392 = vector.load %arg19[%c0_162, %c0_163] : memref<1x128xf32, #tpu.memory_space<vmem>>, vector<1x128xf32>
    %393 = vector.broadcast %392 : vector<1x128xf32> to vector<2x128xf32>
    %394 = arith.addf %391, %393 : vector<2x128xf32>
    %c0_164 = arith.constant 0 : index
    %c0_165 = arith.constant 0 : index
    %395 = vector.load %arg20[%c0_164, %c0_165] : memref<2x128xf32, #tpu.memory_space<vmem>>, vector<2x128xf32>
    tpu.vector_store %arg20[%c0_164, %c0_165], %394 {strides = array<i32>} : memref<2x128xf32, #tpu.memory_space<vmem>>, vector<2x128xf32>,
    return
  }
}

</mosaic_0001>

<bundles_post_ra>
// kernel: transformer_with_cls_forward.1
= control target key start
LH: loop header
LB: loop body
LE: loop exit
PB: predicated region body
PF: predicated region fallthrough
CT: control target
= control target key end

     0   :  { %s4953_s0 = inlined_call_operand.vmem [shape: f32[16,128], index: 0, kind: input, shape index: {}]   ;;  %s4954_s1 = inlined_call_operand.vmem [shape: f32[16,16], index: 1, kind: input, shape index: {}]   ;;  %s4955_s2 = inlined_call_operand.vmem [shape: f32[1,128], index: 2, kind: input, shape index: {}]   ;;  %s4956_s3 = inlined_call_operand.vmem [shape: f32[1,128], index: 3, kind: input, shape index: {}]   ;;  %s4957_s4 = inlined_call_operand.hbm [shape: bf16[2,128,384], index: 4, kind: input, shape index: {}]   ;;  %s4958_s5 = inlined_call_operand.vmem [shape: f32[2,1,384], index: 5, kind: input, shape index: {}]   ;;  %s4959_s6 = inlined_call_operand.vmem [shape: bf16[2,128,128], index: 6, kind: input, shape index: {}]   ;;  %s4960_s7 = inlined_call_operand.vmem [shape: f32[2,1,128], index: 7, kind: input, shape index: {}]   ;;  %s4961_s8 = inlined_call_operand.vmem [shape: f32[2,1,128], index: 8, kind: input, shape index: {}]   ;;  %s4962_s9 = inlined_call_operand.vmem [shape: f32[2,1,128], index: 9, kind: input, shape index: {}]   ;;  %s4963_s10 = inlined_call_operand.vmem [shape: bf16[2,128,256], index: 10, kind: input, shape index: {}]   ;;  %s4964_s11 = inlined_call_operand.vmem [shape: f32[2,1,256], index: 11, kind: input, shape index: {}]   ;;  %s4965_s12 = inlined_call_operand.hbm [shape: bf16[2,256,128], index: 12, kind: input, shape index: {}]   ;;  %s4966_s13 = inlined_call_operand.vmem [shape: f32[2,1,128], index: 13, kind: input, shape index: {}]   ;;  %s4967_s14 = inlined_call_operand.hbm [shape: f32[2,1,128], index: 14, kind: input, shape index: {}]   ;;  %s4968_s15 = inlined_call_operand.hbm [shape: f32[2,1,128], index: 15, kind: input, shape index: {}]   ;;  %s4969_s16 = inlined_call_operand.hbm [shape: bf16[128,128], index: 16, kind: input, shape index: {}]   ;;  %s4970_s17 = inlined_call_operand.hbm [shape: f32[1,128], index: 17, kind: input, shape index: {}]   ;;  %s4971_s18 = inlined_call_operand.vmem [shape: bf16[128,128], index: 18, kind: input, shape index: {}]   ;;  %s4972_s19 = inlined_call_operand.hbm [shape: f32[1,128], index: 19, kind: input, shape index: {}]   ;;  %s4973_s20 = inlined_call_operand.vmem [shape: f32[2,128], index: 20, kind: output, shape index: {}]  }
   0x1   :  { %4980 = sst [smem:[#allocation18_spill]] %s4953_s0 }
   0x2   :  { %4981 = sst [smem:[#allocation19_spill]] %s4954_s1 }
   0x3   :  { %4982 = sst [smem:[#allocation20_spill]] %s4955_s2 }
   0x4   :  { %4983 = sst [smem:[#allocation21_spill]] %s4956_s3 }
   0x5   :  { %4984 = sst [smem:[#allocation22_spill]] %s4957_s4 }
   0x6   :  { %4985 = sst [smem:[#allocation23_spill]] %s4973_s20 }
   0x7   :  { %25 = vsyncpa [#allocation4], 0 }
   0x8   :  { %26 = vsyncpa [#allocation6], 0 }
   0x9   :  { %27 = vsyncpa [#allocation9], 0 }
   0xa   :  { %28 = vsyncpa [#allocation12], 0  ;;  %s4181_s1 = smov [#allocation5]   ;;  %s4019_s2 = scalar_lea.hbm %s4965_s12, 4096 }
   0xb   :  { %s68_s22 = sshll.u32 %s4181_s1, 4  ;;  %p4020_p0 = scmp.ne.s32.totalorder %s4965_s12, %s4019_s2  ;;  %s69_s22 = int_to_ptr.vmem [resolvable:$true] %s68_s22 }
   0xc   :  { %p4023_p1 = scmp.lt.u32.totalorder %s4019_s2, %s4965_s12 }
   0xe   :  { %p4025_p2 = pnand %p4023_p1, %p4020_p0 }
  0x10   :  { %4028 = shalt.err (!%p4025_p2)
}
  0x11   :  { %s4029_s28 = scalar_lea.vmem %s69_s22, 4096  ;;  %p4034_p4 = scmp.lt.s32.totalorder %s69_s22, %s69_s22 }
  0x12   :  { %p4030_p3 = scmp.ne.s32.totalorder %s69_s22, %s4029_s28  ;;  %p4035_p5 = scmp.lt.s32.totalorder %s4029_s28, %s4029_s28 }
  0x14   :  { %p4036_p6 = por %p4035_p5, %p4034_p4 }
  0x16   :  { %p4037_p7 = pnand %p4036_p6, %p4030_p3 }
  0x18   :  { %4040 = shalt.err (!%p4037_p7)
}
  0x19   :  { %s4977_s4 = smov 64   ;;  %s4979_s29 = smov 4  }
  0x1a   :  { %74 = dma.hbm_to_vmem [thread:$0]  %s4965_s12, 4096, %s69_s22, [#allocation6], %s4977_s4, %s4977_s4, %s4979_s29  }
  0x1b   :  { %s4184_s21 = smov [#allocation8]   ;;  %s4185_s23 = smov [#allocation11]  }
  0x1c   :  { %s94_s1 = sshll.u32 %s4184_s21, 4  ;;  %s119_s24 = sshll.u32 %s4185_s23, 4  ;;  %s95_s1 = int_to_ptr.vmem [resolvable:$true] %s94_s1  ;;  %s120_s24 = int_to_ptr.vmem [resolvable:$true] %s119_s24 }
  0x1d   :  { %s4041_s3 = scalar_lea.hbm %s4968_s15, 32 }
  0x1e   :  { %p4042_p8 = scmp.ne.s32.totalorder %s4968_s15, %s4041_s3  ;;  %p4045_p9 = scmp.lt.u32.totalorder %s4041_s3, %s4968_s15 }
  0x20   :  { %p4047_p10 = pnand %p4045_p9, %p4042_p8 }
  0x22   :  { %4050 = shalt.err (!%p4047_p10)
}
  0x23   :  { %s4051_s12 = scalar_lea.vmem %s95_s1, 32  ;;  %p4056_p12 = scmp.lt.s32.totalorder %s95_s1, %s95_s1 }
  0x24   :  { %p4052_p11 = scmp.ne.s32.totalorder %s95_s1, %s4051_s12  ;;  %p4057_p13 = scmp.lt.s32.totalorder %s4051_s12, %s4051_s12 }
  0x26   :  { %p4058_p0 = por %p4057_p13, %p4056_p12 }
  0x28   :  { %p4059_p1 = pnand %p4058_p0, %p4052_p11 }
  0x2a   :  { %4062 = shalt.err (!%p4059_p1)
}
  0x2b   :  { %s4186_s22 = smov 16   ;;  %s4187_s30 = smov 1  }
  0x2c   :  { %100 = dma.hbm_to_vmem [thread:$0]  %s4968_s15, 32, %s95_s1, [#allocation9], %s4186_s22, %s4186_s22, %s4187_s30  }
  0x2d   :  { %s4063_s2 = scalar_lea.hbm %s4970_s17, 16 }
  0x2e   :  { %p4064_p2 = scmp.ne.s32.totalorder %s4970_s17, %s4063_s2  ;;  %p4067_p3 = scmp.lt.u32.totalorder %s4063_s2, %s4970_s17 }
  0x30   :  { %p4069_p4 = pnand %p4067_p3, %p4064_p2 }
  0x32   :  { %4072 = shalt.err (!%p4069_p4)
}
  0x33   :  { %s4073_s28 = scalar_lea.vmem %s120_s24, 16  ;;  %s4077_s12 = scalar_lea.vmem %s120_s24, 32 }
  0x34   :  { %p4074_p5 = scmp.ne.s32.totalorder %s120_s24, %s4073_s28  ;;  %p4078_p6 = scmp.lt.s32.totalorder %s120_s24, %s120_s24 }
  0x35   :  { %p4079_p7 = scmp.lt.s32.totalorder %s4077_s12, %s4073_s28 }
  0x37   :  { %p4080_p8 = por %p4079_p7, %p4078_p6 }
  0x39   :  { %p4081_p9 = pnand %p4080_p8, %p4074_p5 }
  0x3b   :  { %4084 = shalt.err (!%p4081_p9)
}
  0x3c   :  { %122 = dma.hbm_to_vmem [thread:$0]  %s4970_s17, 16, %s120_s24, [#allocation12]  }
  0x3d   :  { %s4188_s0 = smov [#allocation3]   ;;  %s4986_s2 = sld [smem:[#allocation22_spill]] }
  0x3e   :  { %s42_s21 = sshll.u32 %s4188_s0, 4  ;;  %s43_s21 = int_to_ptr.vmem [resolvable:$true] %s42_s21 }
  0x43   :  { %s4085_s25 = scalar_lea.hbm %s4986_s2, 6144 }
  0x44   :  { %p4086_p10 = scmp.ne.s32.totalorder %s4986_s2, %s4085_s25  ;;  %p4089_p11 = scmp.lt.u32.totalorder %s4085_s25, %s4986_s2 }
  0x46   :  { %p4091_p12 = pnand %p4089_p11, %p4086_p10 }
  0x48   :  { %4094 = shalt.err (!%p4091_p12)
}
  0x49   :  { %s4095_s12 = scalar_lea.vmem %s43_s21, 6144  ;;  %p4100_p0 = scmp.lt.s32.totalorder %s43_s21, %s43_s21 }
  0x4a   :  { %p4096_p13 = scmp.ne.s32.totalorder %s43_s21, %s4095_s12  ;;  %p4101_p1 = scmp.lt.s32.totalorder %s4095_s12, %s4095_s12 }
  0x4c   :  { %p4102_p2 = por %p4101_p1, %p4100_p0 }
  0x4e   :  { %p4103_p3 = pnand %p4102_p2, %p4096_p13 }
  0x50   :  { %4106 = shalt.err (!%p4103_p3)
}
  0x51   :  { %s4189_s17 = smov 192   ;;  %s4190_s24 = smov 12  }
  0x52   :  { %48 = dma.hbm_to_vmem [thread:$0]  %s4986_s2, 6144, %s43_s21, [#allocation4], %s4189_s17, %s4189_s17, %s4190_s24  }
  0x53   :  { %s4191_s0 = smov [#allocation7]   ;;  %s4192_s23 = smov [#allocation10]  }
  0x54   :  { %s82_s20 = sshll.u32 %s4191_s0, 4  ;;  %s106_s3 = sshll.u32 %s4192_s23, 4  ;;  %s83_s20 = int_to_ptr.vmem [resolvable:$true] %s82_s20  ;;  %s4358_s3 = int_to_ptr.vmem [resolvable:$true] %s106_s3 }
  0x55   :  { %s4107_s27 = scalar_lea.hbm %s4967_s14, 32 }
  0x56   :  { %p4108_p4 = scmp.ne.s32.totalorder %s4967_s14, %s4107_s27  ;;  %p4111_p5 = scmp.lt.u32.totalorder %s4107_s27, %s4967_s14 }
  0x58   :  { %p4113_p6 = pnand %p4111_p5, %p4108_p4 }
  0x5a   :  { %4116 = shalt.err (!%p4113_p6)
}
  0x5b   :  { %s4117_s21 = scalar_lea.vmem %s83_s20, 32  ;;  %p4122_p8 = scmp.lt.s32.totalorder %s83_s20, %s83_s20 }
  0x5c   :  { %p4118_p7 = scmp.ne.s32.totalorder %s83_s20, %s4117_s21  ;;  %p4123_p9 = scmp.lt.s32.totalorder %s4117_s21, %s4117_s21 }
  0x5e   :  { %p4124_p10 = por %p4123_p9, %p4122_p8 }
  0x60   :  { %p4125_p11 = pnand %p4124_p10, %p4118_p7 }
  0x62   :  { %4128 = shalt.err (!%p4125_p11)
}
  0x63   :  { %88 = dma.hbm_to_vmem [thread:$0]  %s4967_s14, 32, %s83_s20, [#allocation6], %s4186_s22, %s4186_s22, %s4187_s30  }
  0x64   :  { %s4129_s4 = scalar_lea.hbm %s4969_s16, 1024 }
  0x65   :  { %p4130_p12 = scmp.ne.s32.totalorder %s4969_s16, %s4129_s4  ;;  %p4133_p13 = scmp.lt.u32.totalorder %s4129_s4, %s4969_s16 }
  0x67   :  { %p4135_p0 = pnand %p4133_p13, %p4130_p12 }
  0x69   :  { %4138 = shalt.err (!%p4135_p0)
}
  0x6a   :  { %s4139_s25 = scalar_lea.vmem %s4358_s3, 1024  ;;  %p4144_p2 = scmp.lt.s32.totalorder %s4358_s3, %s4358_s3 }
  0x6b   :  { %p4140_p1 = scmp.ne.s32.totalorder %s4358_s3, %s4139_s25  ;;  %p4145_p3 = scmp.lt.s32.totalorder %s4139_s25, %s4139_s25 }
  0x6d   :  { %p4146_p4 = por %p4145_p3, %p4144_p2 }
  0x6f   :  { %p4147_p5 = pnand %p4146_p4, %p4140_p1 }
  0x71   :  { %4150 = shalt.err (!%p4147_p5)
}
  0x72   :  { %s4987_s14 = smov 4   ;;  %s4988_s22 = smov 64  }
  0x73   :  { %112 = dma.hbm_to_vmem [thread:$0]  %s4969_s16, 1024, %s4358_s3, [#allocation9], %s4988_s22, %s4988_s22, %s4987_s14  }
  0x74   :  { %s4193_s26 = smov [#allocation13]   ;;  %s4151_s21 = scalar_lea.hbm %s4972_s19, 16 }
  0x75   :  { %s131_s27 = sshll.u32 %s4193_s26, 4  ;;  %p4152_p6 = scmp.ne.s32.totalorder %s4972_s19, %s4151_s21  ;;  %s132_s27 = int_to_ptr.vmem [resolvable:$true] %s131_s27 }
  0x76   :  { %p4155_p7 = scmp.lt.u32.totalorder %s4151_s21, %s4972_s19 }
  0x78   :  { %p4157_p8 = pnand %p4155_p7, %p4152_p6 }
  0x7a   :  { %4160 = shalt.err (!%p4157_p8)
}
  0x7b   :  { %s4161_s4 = scalar_lea.vmem %s132_s27, 16  ;;  %s4165_s16 = scalar_lea.vmem %s132_s27, 32 }
  0x7c   :  { %p4162_p9 = scmp.ne.s32.totalorder %s132_s27, %s4161_s4  ;;  %p4166_p10 = scmp.lt.s32.totalorder %s132_s27, %s132_s27 }
  0x7d   :  { %p4167_p11 = scmp.lt.s32.totalorder %s4165_s16, %s4161_s4 }
  0x7f   :  { %p4168_p12 = por %p4167_p11, %p4166_p10 }
  0x81   :  { %p4169_p13 = pnand %p4168_p12, %p4162_p9 }
  0x83   :  { %4172 = shalt.err (!%p4169_p13)
}
  0x84   :  { %134 = dma.hbm_to_vmem [thread:$0]  %s4972_s19, 16, %s132_s27, [#allocation12]  }
  0x85   :  { %4173 = dma.done.wait [#allocation4], 6144  }
  0x86   :  { %4174 = vsyncadd [#allocation4], 4294961152 }
  0x87   :  { %4175 = dma.done.wait [#allocation6], 4128  }
  0x88   :  { %4176 = vsyncadd [#allocation6], 4294963168 }
  0x89   :  { %4177 = dma.done.wait [#allocation9], 1056  }
  0x8a   :  { %4178 = vsyncadd [#allocation9], 4294966240 }
  0x8b   :  { %4179 = dma.done.wait [#allocation12], 32  }
  0x8c   :  { %4180 = vsyncadd [#allocation12], 4294967264  ;;  %s4989_s23 = sld [smem:[#allocation18_spill]]  ;;  %v3739_v2 = vld [vmem:[#allocation3 + $0x4] ss:$12 sps:$4 sm:$0xff]   ;;  %v4194_v4 = vmov 0.0   ;;  %v237_v53 = vlaneseq }
  0x8d   :  { %v3741_v3 = vld [vmem:[#allocation3] ss:$12 sps:$4 sm:$0xff]   ;;  %3475 = vmatprep.subr.bf16.mxu1 %v4194_v4  ;;  %v3742_v5 = vld [vmem:[#allocation3 + $0x8] ss:$12 sps:$4 sm:$0xff]   ;;  %380 = vmatprep.subr.bf16.mxu0 %v3739_v2  ;;  %v3745_v15 = vld [vmem:[#allocation3 + $0x18] ss:$12 sps:$4 sm:$0xff]  }
  0x8e   :  { %v3743_v6 = vld [vmem:[#allocation3 + $0x1c] ss:$12 sps:$4 sm:$0xff]   ;;  %381 = vmatpush1.bf16.msra.mxu0 %v3741_v3  ;;  %3476 = vmatpush3.bf16.msra.mxu1 %v3742_v5  ;;  %v3746_v16 = vld [vmem:[#allocation3 + $0x20] ss:$12 sps:$4 sm:$0xff]   ;;  %v3750_v19 = vld [vmem:[#allocation3 + $0x38] ss:$12 sps:$4 sm:$0xff]  }
  0x8f   :  { %382 = vmatprep.subr.bf16.mxu0 %v3743_v6  ;;  %3477 = vmatprep.subr.bf16.mxu1 %v4194_v4  ;;  %v3747_v17 = vld [vmem:[#allocation3 + $0x34] ss:$12 sps:$4 sm:$0xff]   ;;  %v3749_v18 = vld [vmem:[#allocation3 + $0x30] ss:$12 sps:$4 sm:$0xff]   ;;  %v3751_v20 = vld [vmem:[#allocation3 + $0x4c] ss:$12 sps:$4 sm:$0xff]  }
  0x90   :  { %v3753_v21 = vld [vmem:[#allocation3 + $0x48] ss:$12 sps:$4 sm:$0xff]   ;;  %v3754_v22 = vld [vmem:[#allocation3 + $0x50] ss:$12 sps:$4 sm:$0xff]   ;;  %v3757_v24 = vld [vmem:[#allocation3 + $0x60] ss:$12 sps:$4 sm:$0xff]  }
  0x91   :  { %v3755_v23 = vld [vmem:[#allocation3 + $0x64] ss:$12 sps:$4 sm:$0xff]   ;;  %v3758_v25 = vld [vmem:[#allocation3 + $0x68] ss:$12 sps:$4 sm:$0xff]   ;;  %v3762_v28 = vld [vmem:[#allocation3 + $0x80] ss:$12 sps:$4 sm:$0xff]  }
  0x92   :  { %v159_v0 = vld [vmem:[%s4989_s23] sm:$0xff]  ;;  %v160_v1 = vld [vmem:[%s4989_s23 + $0x8] sm:$0xff]  ;;  %383 = vmatpush1.bf16.msra.mxu0 %v3745_v15  ;;  %3478 = vmatpush3.bf16.msra.mxu1 %v3746_v16  ;;  %v4195_v30 = vmov 0   ;;  %vm4196_vm0 = vmmov 0   ;;  %s4990_s20 = sld [smem:[#allocation20_spill]]  ;;  %s4991_s28 = sld [smem:[#allocation21_spill]] }
  0x93   :  { %163 = vadd.xlane.f32.xlu0 %v159_v0  ;;  %3479 = vmatprep.subr.bf16.mxu1 %v4194_v4  ;;  %v3759_v26 = vld [vmem:[#allocation3 + $0x7c] ss:$12 sps:$4 sm:$0xff]   ;;  %v3761_v27 = vld [vmem:[#allocation3 + $0x78] ss:$12 sps:$4 sm:$0xff]   ;;  %v3763_v29 = vld [vmem:[#allocation3 + $0x94] ss:$12 sps:$4 sm:$0xff]  }
  0x94   :  { %384 = vmatprep.subr.bf16.mxu0 %v3747_v17  ;;  %412 = vmatprep.mubr.bf16.mxu0 %v4195_v30  ;;  %v3765_v31 = vld [vmem:[#allocation3 + $0x90] ss:$12 sps:$4 sm:$0xff]   ;;  %v3766_v32 = vld [vmem:[#allocation3 + $0x98] ss:$12 sps:$4 sm:$0xff]   ;;  %v3769_v34 = vld [vmem:[#allocation3 + $0xa8] ss:$12 sps:$4 sm:$0xff]  }
  0x95   :  { %3491 = vmatprep.mubr.msk.bf16.mxu1 %vm4196_vm0, %v4194_v4  ;;  %v3767_v33 = vld [vmem:[#allocation3 + $0xac] ss:$12 sps:$4 sm:$0xff]   ;;  %v3770_v35 = vld [vmem:[#allocation3 + $0xb0] ss:$12 sps:$4 sm:$0xff]   ;;  %v4452_v54 = vshrl.u32 %v237_v53, 7  ;;  %vm467_vm1 = vcmask 261120  }
  0x96   :  { %385 = vmatpush1.bf16.msra.mxu0 %v3749_v18  ;;  %3480 = vmatpush3.bf16.msra.mxu1 %v3750_v19  ;;  %v235_v57 = vld [vmem:[%s4958_s5] sm:$0x7]  ;;  %s4992_s24 = sld [smem:[#allocation19_spill]]  ;;  %vm515_vm2 = vcmask 130048   ;;  %s4197_s16 = smov 96   ;;  %vm975_vm3 = vcmask 523264  }
  0x97   :  { %165 = vadd.xlane.f32.xlu0 %v160_v1  ;;  %3481 = vmatprep.subr.bf16.mxu1 %v4194_v4  ;;  %v4455_v55 = vsub.s32 0, %v4452_v54  ;;  %v247_v56 = vsub.s32 2, %v4452_v54  ;;  %v4462_v58 = vsub.s32 1, %v4452_v54  ;;  %s4198_s3 = smov 32   ;;  %vm978_vm4 = vcmask 785408   ;;  %s4993_s19 = sld [smem:[#allocation23_spill]] }
  0x98   :  { %386 = vmatprep.subr.bf16.mxu0 %v3751_v20  ;;  %v3131_v44 = vld [vmem:[%s4990_s20] ss:$0 sm:$0xff] }
  0x99   :  { %v3132_v48 = vld [vmem:[%s4991_s28] ss:$0 sm:$0xff]  ;;  %v240_v59 = vrot.slane %v235_v57, %v4455_v55  ;;  %v248_v60 = vrot.slane %v235_v57, %v247_v56  ;;  %v244_v63 = vrot.slane %v235_v57, %v4462_v58 }
  0x9a   :  { %387 = vmatpush1.bf16.msra.mxu0 %v3753_v21  ;;  %3482 = vmatpush3.bf16.msra.mxu1 %v3754_v22 }
  0x9b   :  { %3483 = vmatprep.subr.bf16.mxu1 %v4194_v4  ;;  %388 = vmatprep.subr.bf16.mxu0 %v3755_v23 }
  0x9c   :  { %v4480_v17 = vld [vmem:[%s4992_s24] sm:$0xff]  ;;  %v4485_v19 = vld [vmem:[%s4992_s24 + $0x8] sm:$0xff] }
  0x9e   :  { %389 = vmatpush1.bf16.msra.mxu0 %v3757_v24  ;;  %3484 = vmatpush3.bf16.msra.mxu1 %v3758_v25 }
  0x9f   :  { %390 = vmatprep.subr.bf16.mxu0 %v3759_v26  ;;  %3485 = vmatprep.subr.bf16.mxu1 %v4194_v4 }
  0xa2   :  { %391 = vmatpush1.bf16.msra.mxu0 %v3761_v27  ;;  %3486 = vmatpush3.bf16.msra.mxu1 %v3762_v28 }
  0xa3   :  { %392 = vmatprep.subr.bf16.mxu0 %v3763_v29  ;;  %3487 = vmatprep.subr.bf16.mxu1 %v4194_v4 }
  0xa6   :  { %393 = vmatpush1.bf16.msra.mxu0 %v3765_v31  ;;  %3488 = vmatpush3.bf16.msra.mxu1 %v3766_v32 }
  0xa7   :  { %394 = vmatprep.subr.bf16.mxu0 %v3767_v33  ;;  %3489 = vmatprep.subr.bf16.mxu1 %v4194_v4 }
  0xaa   :  { %395 = vmatpush1.bf16.msra.mxu0 %v3769_v34  ;;  %3490 = vmatpush3.bf16.msra.mxu1 %v3770_v35 }
  0xab   :  { %3495 = vmatprep.subr.bf16.mxu1 %v4194_v4  ;;  %3519 = vmatprep.subr.bf16.mxu0 %v4194_v4 }
 0x120   :  { %v164_v7 = vpop.xlane.xlu0 %163 }
 0x121   :  { %v168_v8 = vmul.f32 0.0078125, %v164_v7 }
 0x123   :  { %v4415_v9 = vsub.f32 %v159_v0, %v168_v8 }
 0x124   :  { %v166_v10 = vpop.xlane.xlu0 %165 }
 0x125   :  { %v169_v11 = vmul.f32 0.0078125, %v166_v10  ;;  %v172_v12 = vmul.f32 %v4415_v9, %v4415_v9 }
 0x127   :  { %v4419_v13 = vsub.f32 %v160_v1, %v169_v11  ;;  %174 = vadd.xlane.f32.xlu1 %v172_v12 }
 0x129   :  { %v173_v14 = vmul.f32 %v4419_v13, %v4419_v13 }
 0x12b   :  { %176 = vadd.xlane.f32.xlu1 %v173_v14 }
 0x1b4   :  { %v175_v36 = vpop.xlane.xlu1 %174 }
 0x1b5   :  { %v178_v37 = vmul.f32 0.0078125, %v175_v36 }
 0x1b7   :  { %v180_v38 = vadd.f32 1e-12, %v178_v37 }
 0x1b8   :  { %v177_v39 = vpop.xlane.xlu1 %176 }
 0x1b9   :  { %3915 = vrsqrt.f32 %v180_v38  ;;  %v179_v40 = vmul.f32 0.0078125, %v177_v39 }
 0x1bb   :  { %v181_v41 = vadd.f32 1e-12, %v179_v40 }
 0x1bd   :  { %3917 = vrsqrt.f32 %v181_v41 }
 0x1c3   :  { %v3916_v42 = vpop.eup %3915 }
 0x1c4   :  { %v184_v43 = vmul.f32 %v3916_v42, %v4415_v9 }
 0x1c6   :  { %v192_v47 = vmul.f32 %v3131_v44, %v184_v43 }
 0x1c7   :  { %v3918_v45 = vpop.eup %3917 }
 0x1c8   :  { %v185_v46 = vmul.f32 %v3918_v45, %v4419_v13  ;;  %v4442_v50 = vadd.f32 %v3132_v48, %v192_v47 }
 0x1ca   :  { %v193_v49 = vmul.f32 %v3131_v44, %v185_v46 }
 0x1cc   :  { %v4444_v51 = vadd.f32 %v3132_v48, %v193_v49 }
 0x1ce   :  { %v202_v52 = vpack.c.bf16 %v4444_v51, %v4442_v50 }
 0x1d0   :  { %413 = vmatmul.mubr.bf16.vlgmr.msra.gmra.mrb[0].mxu0 %v202_v52  ;;  %3492 = vmatmul.mubr.bf16.vlgmr.msra.gmra.mrb[0].mxu1 %v202_v52 }
 0x1d1   :  { %3497 = vmatprep.mubr.msk.bf16.mxu1 %vm4196_vm0, %v4194_v4  ;;  %3521 = vmatprep.mubr.msk.bf16.mxu0 %vm4196_vm0, %v4194_v4 }
 0x2a3   :  { %v414_v61 = vpop.f32.mrb[0].mxu0  ;;  %v457_v62 = vpop.f32.mrb[0].mxu1 }
 0x2a4   :  { %v416_v0 = vpop.f32.mrb[1].mxu0  ;;  %v3493_v1 = vpop.f32.mrb[1].mxu1  ;;  %v415_v5 = vadd.f32 %v414_v61, %v240_v59  ;;  %v458_v6 = vadd.f32 %v457_v62, %v248_v60 }
 0x2a5   :  { %v418_v2 = vpop.f32.mrb[2].mxu0  ;;  %v460_v3 = vpop.f32.mrb[2].mxu1  ;;  %v417_v11 = vadd.f32 %v416_v0, %v244_v63 }
 0x2a6   :  { %v419_v7 = vadd.f32 %v418_v2, %v240_v59  ;;  %v461_v8 = vadd.f32 %v460_v3, %v248_v60  ;;  %v420_v9 = vpop.f32.mrb[3].mxu0  ;;  %v3494_v10 = vpop.f32.mrb[3].mxu1 }
 0x2a7   :  { %v421_v12 = vadd.f32 %v420_v9, %v244_v63 }
 0x2a8   :  { %v464_v13 = vpack.c.bf16 %v419_v7, %v415_v5  ;;  %v4468_v14 = vpack.c.bf16 %v461_v8, %v458_v6 }
 0x2a9   :  { %v465_v15 = vpack.c.bf16 %v421_v12, %v417_v11 }
 0x2ab   :  { %v472_v16 = vsel %vm467_vm1, %v465_v15, 0 }
 0x2ac   :  { %3496 = vmatpush3.bf16.xpose.msra.mxu1 %v472_v16 }
 0x2ad   :  { %3501 = vmatprep.subr.bf16.mxu1 %v4194_v4 }
 0x2b3   :  { %3498 = vmatmul.mubr.msk.bf16.vlgmr.msra.gmra.mrb[4].mxu1 %vm467_vm1, %v464_v13 }
 0x2b4   :  { %3502 = vmatpush3.bf16.msra.mxu1 %v4468_v14  ;;  %3503 = vmatprep.mubr.msk.bf16.mxu1 %vm4196_vm0, %v4194_v4 }
 0x2b5   :  { %3507 = vmatprep.subr.bf16.mxu1 %v4194_v4 }
 0x386   :  { %v508_v18 = vpop.f32.mrb[4].mxu1 }
 0x387   :  { %v509_v20 = vadd.f32 %v508_v18, %v4480_v17  ;;  %v3499_v21 = vpop.f32.mrb[5].mxu1 }
 0x388   :  { %v511_v22 = vpop.f32.mrb[6].mxu1 }
 0x389   :  { %v512_v23 = vadd.f32 %v511_v22, %v4485_v19  ;;  %v3500_v24 = vpop.f32.mrb[7].mxu1  ;;  %v516_v25 = vsel %vm515_vm2, %v509_v20, -inf }
 0x38a   :  { %517 = vmax.xlane.f32.xlu0 %v516_v25 }
 0x38b   :  { %v519_v26 = vsel %vm515_vm2, %v512_v23, -inf }
 0x38c   :  { %520 = vmax.xlane.f32.xlu1 %v519_v26 }
 0x417   :  { %v518_v27 = vpop.xlane.xlu0 %517 }
 0x418   :  { %v522_v28 = vsub.f32 %v509_v20, %v518_v27 }
 0x419   :  { %v521_v29 = vpop.xlane.xlu1 %520 }
 0x41a   :  { %v524_v31 = vmul.f32 1.442695, %v522_v28  ;;  %v523_v32 = vsub.f32 %v512_v23, %v521_v29 }
 0x41c   :  { %3919 = vpow2.f32 %v524_v31  ;;  %v526_v33 = vmul.f32 1.442695, %v523_v32 }
 0x41e   :  { %3921 = vpow2.f32 %v526_v33 }
 0x426   :  { %v3920_v34 = vpop.eup %3919 }
 0x427   :  { %v528_v35 = vsel %vm515_vm2, %v3920_v34, 0.0 }
 0x428   :  { %v3922_v36 = vpop.eup %3921  ;;  %529 = vadd.xlane.f32.xlu0 %v528_v35 }
 0x429   :  { %v531_v37 = vsel %vm515_vm2, %v3922_v36, 0.0 }
 0x42a   :  { %532 = vadd.xlane.f32.xlu1 %v531_v37 }
 0x43b   :  { %584 = vrot.lane.b32.xlu1 %v464_v13, %s4197_s16 }
 0x43e   :  { %587 = vrot.lane.b32.xlu0 %v465_v15, %s4197_s16 }
 0x43f   :  { %709 = vrot.lane.b32.xlu1 %v465_v15, %s4988_s22 }
 0x442   :  { %830 = vrot.lane.b32.xlu0 %v465_v15, %s4198_s3 }
 0x443   :  { %707 = vrot.lane.b32.xlu1 %v464_v13, %s4988_s22 }
 0x447   :  { %828 = vrot.lane.b32.xlu1 %v464_v13, %s4198_s3 }
 0x4b5   :  { %v530_v38 = vpop.xlane.xlu0 %529 }
 0x4b6   :  { %3923 = vrcp.f32 %v530_v38 }
 0x4b7   :  { %v533_v39 = vpop.xlane.xlu1 %532 }
 0x4b8   :  { %3925 = vrcp.f32 %v533_v39 }
 0x4b9   :  { %v588_v41 = vpop.permute.xlu0 %587 }
 0x4ba   :  { %v593_v52 = vsel %vm467_vm1, %v588_v41, 0 }
 0x4bb   :  { %v585_v40 = vpop.permute.xlu1 %584 }
 0x4bd   :  { %v831_v48 = vpop.permute.xlu0 %830 }
 0x4be   :  { %v836_v57 = vsel %vm467_vm1, %v831_v48, 0 }
 0x4bf   :  { %v710_v42 = vpop.permute.xlu1 %709 }
 0x4c0   :  { %v3924_v43 = vpop.eup %3923  ;;  %v715_v44 = vsel %vm467_vm1, %v710_v42, 0 }
 0x4c1   :  { %3520 = vmatpush3.bf16.xpose.msra.mxu0 %v715_v44  ;;  %v536_v46 = vmul.f32 %v3924_v43, %v3920_v34 }
 0x4c2   :  { %v3926_v45 = vpop.eup %3925  ;;  %3531 = vmatprep.subr.bf16.mxu0 %v4194_v4 }
 0x4c3   :  { %v537_v47 = vmul.f32 %v3926_v45, %v3922_v36  ;;  %v708_v53 = vpop.permute.xlu1 %707 }
 0x4c5   :  { %v538_v49 = vpack.c.bf16 %v537_v47, %v536_v46 }
 0x4c7   :  { %3504 = vmatmul.mubr.msk.bf16.vlgmr.msra.gmra.mrb[8].mxu1 %vm515_vm2, %v538_v49  ;;  %v829_v59 = vpop.permute.xlu1 %828 }
 0x4c8   :  { %3508 = vmatpush3.bf16.xpose.msra.mxu1 %v593_v52  ;;  %3522 = vmatmul.mubr.msk.bf16.vlgmr.msra.gmra.mrb[4].mxu0 %vm467_vm1, %v708_v53 }
 0x4c9   :  { %3532 = vmatpush3.bf16.xpose.msra.mxu0 %v836_v57  ;;  %3509 = vmatprep.mubr.msk.bf16.mxu1 %vm4196_vm0, %v4194_v4 }
 0x4ca   :  { %3533 = vmatprep.mubr.msk.bf16.mxu0 %vm4196_vm0, %v4194_v4  ;;  %3513 = vmatprep.subr.bf16.mxu1 %v4194_v4 }
 0x4cb   :  { %3543 = vmatprep.subr.bf16.mxu0 %v4194_v4 }
 0x4cf   :  { %3510 = vmatmul.mubr.msk.bf16.vlgmr.msra.gmra.mrb[12].mxu1 %vm467_vm1, %v585_v40 }
 0x4d0   :  { %3534 = vmatmul.mubr.msk.bf16.vlgmr.msra.gmra.mrb[8].mxu0 %vm467_vm1, %v829_v59  ;;  %3515 = vmatprep.mubr.msk.bf16.mxu1 %vm4196_vm0, %v4194_v4 }
 0x4d1   :  { %3559 = vmatprep.mubr.msk.bf16.mxu0 %vm4196_vm0, %v4194_v4 }
 0x59a   :  { %v4517_v60 = vpop.f32.mrb[8].mxu1 }
 0x59b   :  { %v3505_v61 = vpop.f32.mrb[9].mxu1  ;;  %v751_v62 = vpop.f32.mrb[4].mxu0 }
 0x59c   :  { %v4519_v63 = vpop.f32.mrb[10].mxu1  ;;  %v3523_v0 = vpop.f32.mrb[5].mxu0  ;;  %v752_v11 = vadd.f32 %v751_v62, %v4480_v17 }
 0x59d   :  { %v3506_v1 = vpop.f32.mrb[11].mxu1  ;;  %v754_v2 = vpop.f32.mrb[6].mxu0 }
 0x59e   :  { %v3524_v3 = vpop.f32.mrb[7].mxu0  ;;  %v755_v22 = vadd.f32 %v754_v2, %v4485_v19  ;;  %v758_v23 = vsel %vm515_vm2, %v752_v11, -inf }
 0x5a0   :  { %v761_v26 = vsel %vm515_vm2, %v755_v22, -inf }
 0x5a2   :  { %v629_v5 = vpop.f32.mrb[12].mxu1 }
 0x5a3   :  { %v630_v6 = vadd.f32 %v629_v5, %v4480_v17  ;;  %v3511_v7 = vpop.f32.mrb[13].mxu1  ;;  %v872_v8 = vpop.f32.mrb[8].mxu0 }
 0x5a4   :  { %v632_v9 = vpop.f32.mrb[14].mxu1  ;;  %v3535_v10 = vpop.f32.mrb[9].mxu0  ;;  %v873_v25 = vadd.f32 %v872_v8, %v4480_v17 }
 0x5a5   :  { %v633_v12 = vadd.f32 %v632_v9, %v4485_v19  ;;  %v3512_v13 = vpop.f32.mrb[15].mxu1  ;;  %v875_v15 = vpop.f32.mrb[10].mxu0  ;;  %v636_v16 = vsel %vm515_vm2, %v630_v6, -inf }
 0x5a6   :  { %637 = vmax.xlane.f32.xlu0 %v636_v16  ;;  %v3536_v18 = vpop.f32.mrb[11].mxu0  ;;  %v876_v20 = vadd.f32 %v875_v15, %v4485_v19  ;;  %v879_v27 = vsel %vm515_vm2, %v873_v25, -inf }
 0x5a7   :  { %v639_v21 = vsel %vm515_vm2, %v633_v12, -inf }
 0x5a8   :  { %640 = vmax.xlane.f32.xlu1 %v639_v21  ;;  %v882_v24 = vsel %vm515_vm2, %v876_v20, -inf }
 0x5aa   :  { %759 = vmax.xlane.f32.xlu0 %v758_v23 }
 0x5ac   :  { %883 = vmax.xlane.f32.xlu1 %v882_v24 }
 0x5ae   :  { %762 = vmax.xlane.f32.xlu0 %v761_v26 }
 0x5b2   :  { %880 = vmax.xlane.f32.xlu0 %v879_v27 }
 0x633   :  { %v638_v28 = vpop.xlane.xlu0 %637 }
 0x634   :  { %v642_v37 = vsub.f32 %v630_v6, %v638_v28  ;;  %v3771_v28 = vld [vmem:[%s4959_s6] sm:$0xff]  }
 0x635   :  { %v641_v29 = vpop.xlane.xlu1 %640  ;;  %3544 = vmatpush3.bf16.msra.mxu0 %v3771_v28 }
 0x636   :  { %v643_v38 = vsub.f32 %v633_v12, %v641_v29  ;;  %v644_v42 = vmul.f32 1.442695, %v642_v37  ;;  %v3772_v29 = vld [vmem:[%s4959_s6 + $0x8] sm:$0xff]   ;;  %3545 = vmatprep.subr.bf16.mxu0 %v4194_v4 }
 0x637   :  { %v760_v31 = vpop.xlane.xlu0 %759 }
 0x638   :  { %v764_v32 = vsub.f32 %v752_v11, %v760_v31  ;;  %v646_v43 = vmul.f32 1.442695, %v643_v38  ;;  %v3773_v31 = vld [vmem:[%s4959_s6 + $0x10] sm:$0xff]  }
 0x639   :  { %v884_v33 = vpop.xlane.xlu1 %883  ;;  %3546 = vmatpush3.bf16.msra.mxu0 %v3772_v29 }
 0x63a   :  { %v766_v19 = vmul.f32 1.442695, %v764_v32  ;;  %v886_v34 = vsub.f32 %v876_v20, %v884_v33  ;;  %3547 = vmatprep.subr.bf16.mxu0 %v4194_v4  ;;  %v3774_v32 = vld [vmem:[%s4959_s6 + $0x18] sm:$0xff]   ;;  %v3775_v33 = vld [vmem:[%s4959_s6 + $0x20] sm:$0xff]  }
 0x63b   :  { %v763_v35 = vpop.xlane.xlu0 %762 }
 0x63c   :  { %3927 = vpow2.f32 %v766_v19  ;;  %v765_v36 = vsub.f32 %v755_v22, %v763_v35  ;;  %v889_v39 = vmul.f32 1.442695, %v886_v34  ;;  %v3776_v35 = vld [vmem:[%s4959_s6 + $0x28] sm:$0xff]  }
 0x63d   :  { %3548 = vmatpush3.bf16.msra.mxu0 %v3773_v31  ;;  %v3787_v31 = vld [vmem:[%s4963_s10 + $0x24] ss:$8 sps:$4 sm:$0xff]  }
 0x63e   :  { %v768_v17 = vmul.f32 1.442695, %v765_v36  ;;  %3549 = vmatprep.subr.bf16.mxu0 %v4194_v4 }
 0x63f   :  { %v881_v40 = vpop.xlane.xlu0 %880 }
 0x640   :  { %3929 = vpow2.f32 %v768_v17  ;;  %v885_v41 = vsub.f32 %v873_v25, %v881_v40 }
 0x641   :  { %3931 = vpow2.f32 %v889_v39  ;;  %3550 = vmatpush3.bf16.msra.mxu0 %v3774_v32  ;;  %v3777_v39 = vld [vmem:[%s4959_s6 + $0x30] sm:$0xff]   ;;  %v3785_v32 = vld [vmem:[%s4963_s10 + $0x20] ss:$8 sps:$4 sm:$0xff]  }
 0x642   :  { %v887_v44 = vmul.f32 1.442695, %v885_v41  ;;  %3551 = vmatprep.subr.bf16.mxu0 %v4194_v4  ;;  %v3778_v41 = vld [vmem:[%s4959_s6 + $0x38] sm:$0xff]  }
 0x644   :  { %3933 = vpow2.f32 %v887_v44 }
 0x645   :  { %3935 = vpow2.f32 %v644_v42  ;;  %3552 = vmatpush3.bf16.msra.mxu0 %v3775_v33  ;;  %v3790_v33 = vld [vmem:[%s4963_s10 + $0x34] ss:$8 sps:$4 sm:$0xff]  }
 0x646   :  { %v3928_v45 = vpop.eup %3927  ;;  %3937 = vpow2.f32 %v646_v43  ;;  %3553 = vmatprep.subr.bf16.mxu0 %v4194_v4 }
 0x647   :  { %v770_v46 = vsel %vm515_vm2, %v3928_v45, 0.0 }
 0x648   :  { %771 = vadd.xlane.f32.xlu0 %v770_v46 }
 0x649   :  { %3554 = vmatpush3.bf16.msra.mxu0 %v3776_v35  ;;  %v3791_v35 = vld [vmem:[%s4963_s10 + $0x40] ss:$8 sps:$4 sm:$0xff]  }
 0x64a   :  { %v3930_v47 = vpop.eup %3929  ;;  %3555 = vmatprep.subr.bf16.mxu0 %v4194_v4 }
 0x64b   :  { %v773_v48 = vsel %vm515_vm2, %v3930_v47, 0.0  ;;  %v3932_v49 = vpop.eup %3931 }
 0x64c   :  { %774 = vadd.xlane.f32.xlu1 %v773_v48  ;;  %v894_v57 = vsel %vm515_vm2, %v3932_v49, 0.0 }
 0x64d   :  { %3556 = vmatpush3.bf16.msra.mxu0 %v3777_v39  ;;  %v3797_v39 = vld [vmem:[%s4963_s10 + $0x60] ss:$8 sps:$4 sm:$0xff]  }
 0x64e   :  { %v3934_v52 = vpop.eup %3933  ;;  %3557 = vmatprep.subr.bf16.mxu0 %v4194_v4 }
 0x64f   :  { %v3936_v53 = vpop.eup %3935  ;;  %v891_v59 = vsel %vm515_vm2, %v3934_v52, 0.0 }
 0x650   :  { %v3938_v61 = vpop.eup %3937  ;;  %895 = vadd.xlane.f32.xlu1 %v894_v57  ;;  %892 = vadd.xlane.f32.xlu0 %v891_v59  ;;  %v648_v0 = vsel %vm515_vm2, %v3936_v53, 0.0 }
 0x651   :  { %v651_v62 = vsel %vm515_vm2, %v3938_v61, 0.0  ;;  %3558 = vmatpush3.bf16.msra.mxu0 %v3778_v41 }
 0x654   :  { %652 = vadd.xlane.f32.xlu1 %v651_v62  ;;  %649 = vadd.xlane.f32.xlu0 %v648_v0 }
 0x665   :  { %781 = vrot.lane.b32.xlu1 %v4468_v14, %s4988_s22 }
 0x669   :  { %902 = vrot.lane.b32.xlu1 %v4468_v14, %s4198_s3 }
 0x66a   :  { %660 = vrot.lane.b32.xlu0 %v4468_v14, %s4197_s16 }
 0x6d5   :  { %v772_v1 = vpop.xlane.xlu0 %771 }
 0x6d9   :  { %v775_v2 = vpop.xlane.xlu1 %774 }
 0x6dd   :  { %v896_v3 = vpop.xlane.xlu1 %895  ;;  %v893_v5 = vpop.xlane.xlu0 %892 }
 0x6e1   :  { %v653_v6 = vpop.xlane.xlu1 %652  ;;  %v650_v7 = vpop.xlane.xlu0 %649 }
 0x6e2   :  { %3939 = vrcp.f32 %v653_v6 }
 0x6e3   :  { %3941 = vrcp.f32 %v650_v7 }
 0x6e4   :  { %3943 = vrcp.f32 %v775_v2 }
 0x6e5   :  { %v661_v8 = vpop.permute.xlu0 %660  ;;  %3945 = vrcp.f32 %v772_v1  ;;  %v782_v15 = vpop.permute.xlu1 %781 }
 0x6e6   :  { %3514 = vmatpush3.bf16.msra.mxu1 %v661_v8  ;;  %3947 = vrcp.f32 %v896_v3 }
 0x6e7   :  { %3525 = vmatprep.subr.bf16.mxu1 %v4194_v4  ;;  %3949 = vrcp.f32 %v893_v5 }
 0x6e9   :  { %v903_v24 = vpop.permute.xlu1 %902 }
 0x6ec   :  { %v3940_v9 = vpop.eup %3939 }
 0x6ed   :  { %v3942_v10 = vpop.eup %3941  ;;  %v657_v11 = vmul.f32 %v3940_v9, %v3938_v61 }
 0x6ee   :  { %v656_v12 = vmul.f32 %v3942_v10, %v3936_v53  ;;  %v3944_v13 = vpop.eup %3943 }
 0x6ef   :  { %v3946_v16 = vpop.eup %3945  ;;  %v779_v18 = vmul.f32 %v3944_v13, %v3930_v47 }
 0x6f0   :  { %v658_v14 = vpack.c.bf16 %v657_v11, %v656_v12  ;;  %v778_v20 = vmul.f32 %v3946_v16, %v3928_v45  ;;  %v3948_v21 = vpop.eup %3947  ;;  %v3165_v11 = vld [vmem:[%s4960_s7] ss:$0 sm:$0xff] }
 0x6f1   :  { %v3950_v23 = vpop.eup %3949  ;;  %v900_v25 = vmul.f32 %v3948_v21, %v3932_v49  ;;  %v3781_v21 = vld [vmem:[%s4963_s10 + $0x4] ss:$8 sps:$4 sm:$0xff]  }
 0x6f2   :  { %3516 = vmatmul.mubr.msk.bf16.vlgmr.msra.gmra.mrb[16].mxu1 %vm515_vm2, %v658_v14  ;;  %v780_v22 = vpack.c.bf16 %v779_v18, %v778_v20  ;;  %v899_v26 = vmul.f32 %v3950_v23, %v3934_v52  ;;  %v3779_v20 = vld [vmem:[%s4963_s10] ss:$8 sps:$4 sm:$0xff]  }
 0x6f3   :  { %3526 = vmatpush3.bf16.msra.mxu1 %v782_v15  ;;  %3527 = vmatprep.mubr.msk.bf16.mxu1 %vm4196_vm0, %v4194_v4 }
 0x6f4   :  { %3537 = vmatprep.subr.bf16.mxu1 %v4194_v4  ;;  %v901_v27 = vpack.c.bf16 %v900_v25, %v899_v26 }
 0x6fa   :  { %3528 = vmatmul.mubr.msk.bf16.vlgmr.msra.gmra.mrb[20].mxu1 %vm515_vm2, %v780_v22  ;;  %v3784_v22 = vld [vmem:[%s4963_s10 + $0x14] ss:$8 sps:$4 sm:$0xff]  }
 0x6fb   :  { %3538 = vmatpush3.bf16.msra.mxu1 %v903_v24  ;;  %3539 = vmatprep.mubr.msk.bf16.mxu1 %vm4196_vm0, %v4194_v4 }
 0x6fc   :  { %1245 = vmatprep.subr.bf16.mxu1 %v3781_v21 }
 0x702   :  { %3540 = vmatmul.mubr.msk.bf16.vlgmr.msra.gmra.mrb[24].mxu1 %vm515_vm2, %v901_v27 }
 0x703   :  { %1277 = vmatprep.mubr.bf16.mxu1 %v4195_v30  ;;  %1246 = vmatpush1.bf16.msra.mxu1 %v3779_v20 }
 0x704   :  { %1247 = vmatprep.subr.bf16.mxu1 %v3784_v22 }
 0x7c5   :  { %v700_v19 = vpop.f32.mrb[16].mxu1 }
 0x7c6   :  { %v3517_v34 = vpop.f32.mrb[17].mxu1 }
 0x7c7   :  { %v703_v36 = vpop.f32.mrb[18].mxu1  ;;  %v3793_v34 = vld [vmem:[%s4963_s10 + $0x44] ss:$8 sps:$4 sm:$0xff]  }
 0x7c8   :  { %v3709_v37 = vpack.i.bf16 %v703_v36, %v700_v19  ;;  %v3518_v38 = vpop.f32.mrb[19].mxu1  ;;  %v3788_v19 = vld [vmem:[%s4963_s10 + $0x30] ss:$8 sps:$4 sm:$0xff]   ;;  %v3796_v36 = vld [vmem:[%s4963_s10 + $0x54] ss:$8 sps:$4 sm:$0xff]  }
 0x7c9   :  { %v3799_v38 = vld [vmem:[%s4963_s10 + $0x64] ss:$8 sps:$4 sm:$0xff]  }
 0x7ca   :  { %3710 = vrot.lane.b32.xlu1 %v3709_v37, %s4198_s3  ;;  %v3794_v37 = vld [vmem:[%s4963_s10 + $0x50] ss:$8 sps:$4 sm:$0xff]  }
 0x7cd   :  { %v821_v17 = vpop.f32.mrb[20].mxu1 }
 0x7ce   :  { %v3529_v40 = vpop.f32.mrb[21].mxu1 }
 0x7cf   :  { %v824_v42 = vpop.f32.mrb[22].mxu1  ;;  %v3800_v40 = vld [vmem:[%s4963_s10 + $0x70] ss:$8 sps:$4 sm:$0xff]  }
 0x7d0   :  { %v3714_v43 = vpack.i.bf16 %v824_v42, %v821_v17  ;;  %v3530_v44 = vpop.f32.mrb[23].mxu1  ;;  %v3802_v17 = vld [vmem:[%s4963_s10 + $0x74] ss:$8 sps:$4 sm:$0xff]  }
 0x7d2   :  { %3715 = vrot.lane.b32.xlu0 %v3714_v43, %s4988_s22 }
 0x7d5   :  { %v942_v45 = vpop.f32.mrb[24].mxu1 }
 0x7d6   :  { %v3541_v46 = vpop.f32.mrb[25].mxu1 }
 0x7d7   :  { %v945_v47 = vpop.f32.mrb[26].mxu1 }
 0x7d8   :  { %v3719_v48 = vpack.i.bf16 %v945_v47, %v942_v45  ;;  %v3542_v49 = vpop.f32.mrb[27].mxu1 }
 0x7d9   :  { %v3174_v49 = vld [vmem:[%s4961_s8] ss:$0 sm:$0xff] }
 0x7da   :  { %3720 = vrot.lane.b32.xlu1 %v3719_v48, %s4197_s16 }
 0x83c   :  { %v3711_v52 = vpop.permute.xlu1 %3710 }
 0x83d   :  { %v3713_v57 = vunpack.i.h.bf16 %v3711_v52  ;;  %v3712_v59 = vunpack.i.l.bf16 %v3711_v52 }
 0x83f   :  { %v974_v1 = vsel %vm467_vm1, %v4519_v63, %v3713_v57  ;;  %v973_v2 = vsel %vm467_vm1, %v4517_v60, %v3712_v59  ;;  %v3175_v59 = vld [vmem:[%s4962_s9] ss:$0 sm:$0xff] }
 0x844   :  { %v3716_v53 = vpop.permute.xlu0 %3715 }
 0x845   :  { %v3718_v61 = vunpack.i.h.bf16 %v3716_v53  ;;  %v3717_v62 = vunpack.i.l.bf16 %v3716_v53 }
 0x847   :  { %v977_v6 = vsel %vm975_vm3, %v974_v1, %v3718_v61  ;;  %v976_v7 = vsel %vm975_vm3, %v973_v2, %v3717_v62  ;;  %v3803_v2 = vld [vmem:[#allocation5 + $0x40] sm:$0xff]  }
 0x848   :  { %3379 = vmatprep.subr.bf16.mxu0 %v3803_v2 }
 0x84c   :  { %v3721_v0 = vpop.permute.xlu1 %3720 }
 0x84d   :  { %v3723_v3 = vunpack.i.h.bf16 %v3721_v0  ;;  %v3722_v5 = vunpack.i.l.bf16 %v3721_v0 }
 0x84f   :  { %v980_v8 = vsel %vm978_vm4, %v977_v6, %v3723_v3  ;;  %v979_v9 = vsel %vm978_vm4, %v976_v7, %v3722_v5  ;;  %v3804_v3 = vld [vmem:[#allocation5] sm:$0xff]   ;;  %v3805_v5 = vld [vmem:[#allocation5 + $0x48] sm:$0xff]   ;;  %v3807_v7 = vld [vmem:[#allocation5 + $0x50] sm:$0xff]  }
 0x850   :  { %v981_v10 = vpack.c.bf16 %v980_v8, %v979_v9  ;;  %v3806_v6 = vld [vmem:[#allocation5 + $0x8] sm:$0xff]   ;;  %v3808_v8 = vld [vmem:[#allocation5 + $0x10] sm:$0xff]   ;;  %v3809_v9 = vld [vmem:[#allocation5 + $0x58] sm:$0xff]  }
 0x852   :  { %3560 = vmatmul.mubr.bf16.vlgmr.msra.gmra.mrb[12].mxu0 %v981_v10  ;;  %v3810_v10 = vld [vmem:[#allocation5 + $0x18] sm:$0xff]  }
 0x853   :  { %3380 = vmatpush3.bf16.msra.mxu0 %v3804_v3 }
 0x854   :  { %3381 = vmatprep.subr.bf16.mxu0 %v3805_v5 }
 0x857   :  { %3382 = vmatpush3.bf16.msra.mxu0 %v3806_v6 }
 0x858   :  { %3383 = vmatprep.subr.bf16.mxu0 %v3807_v7 }
 0x85b   :  { %3384 = vmatpush3.bf16.msra.mxu0 %v3808_v8 }
 0x85c   :  { %3385 = vmatprep.subr.bf16.mxu0 %v3809_v9 }
 0x85f   :  { %3386 = vmatpush3.bf16.msra.mxu0 %v3810_v10 }
 0x925   :  { %v1087_v63 = vpop.f32.mrb[12].mxu0 }
 0x926   :  { %v1088_v12 = vadd.f32 %v3165_v11, %v1087_v63  ;;  %v3561_v14 = vpop.f32.mrb[13].mxu0  ;;  %v3812_v63 = vld [vmem:[#allocation5 + $0x20] sm:$0xff]  }
 0x927   :  { %v1090_v60 = vpop.f32.mrb[14].mxu0  ;;  %v3814_v14 = vld [vmem:[#allocation5 + $0x28] sm:$0xff]  }
 0x928   :  { %v1091_v13 = vadd.f32 %v3165_v11, %v1090_v60  ;;  %v3562_v15 = vpop.f32.mrb[15].mxu0  ;;  %v1094_v16 = vadd.f32 %v1088_v12, %v4442_v50  ;;  %v3782_v50 = vld [vmem:[%s4963_s10 + $0x10] ss:$8 sps:$4 sm:$0xff]   ;;  %v3815_v60 = vld [vmem:[#allocation5 + $0x70] sm:$0xff]  }
 0x929   :  { %1248 = vmatpush1.bf16.msra.mxu1 %v3782_v50  ;;  %v3811_v11 = vld [vmem:[#allocation5 + $0x60] sm:$0xff]   ;;  %v3813_v12 = vld [vmem:[#allocation5 + $0x68] sm:$0xff]   ;;  %v3817_v15 = vld [vmem:[#allocation5 + $0x78] sm:$0xff]  }
 0x92a   :  { %1098 = vadd.xlane.f32.xlu0 %v1094_v16  ;;  %v1095_v18 = vadd.f32 %v1091_v13, %v4444_v51  ;;  %1249 = vmatprep.subr.bf16.mxu1 %v3787_v31  ;;  %v3816_v13 = vld [vmem:[#allocation5 + $0x30] sm:$0xff]  }
 0x92b   :  { %3387 = vmatprep.subr.bf16.mxu0 %v3811_v11 }
 0x92c   :  { %1100 = vadd.xlane.f32.xlu1 %v1095_v18  ;;  %3388 = vmatpush3.bf16.msra.mxu0 %v3812_v63 }
 0x92d   :  { %1250 = vmatpush1.bf16.msra.mxu1 %v3785_v32  ;;  %3389 = vmatprep.subr.bf16.mxu0 %v3813_v12  ;;  %v3192_v12 = vld [vmem:[%s4966_s13] ss:$0 sm:$0xff] }
 0x92e   :  { %1251 = vmatprep.subr.bf16.mxu1 %v3790_v33 }
 0x930   :  { %3390 = vmatpush3.bf16.msra.mxu0 %v3814_v14 }
 0x931   :  { %1252 = vmatpush1.bf16.msra.mxu1 %v3788_v19  ;;  %3391 = vmatprep.subr.bf16.mxu0 %v3815_v60 }
 0x932   :  { %1253 = vmatprep.subr.bf16.mxu1 %v3793_v34 }
 0x934   :  { %3392 = vmatpush3.bf16.msra.mxu0 %v3816_v13 }
 0x935   :  { %1254 = vmatpush1.bf16.msra.mxu1 %v3791_v35  ;;  %3393 = vmatprep.subr.bf16.mxu0 %v3817_v15 }
 0x936   :  { %1255 = vmatprep.subr.bf16.mxu1 %v3796_v36 }
 0x939   :  { %1256 = vmatpush1.bf16.msra.mxu1 %v3794_v37 }
 0x93a   :  { %1257 = vmatprep.subr.bf16.mxu1 %v3799_v38 }
 0x93d   :  { %1258 = vmatpush1.bf16.msra.mxu1 %v3797_v39 }
 0x93e   :  { %1259 = vmatprep.subr.bf16.mxu1 %v3802_v17 }
 0x941   :  { %1260 = vmatpush1.bf16.msra.mxu1 %v3800_v40 }
 0x9b7   :  { %v1099_v51 = vpop.xlane.xlu0 %1098 }
 0x9b8   :  { %v1102_v23 = vmul.f32 0.0078125, %v1099_v51 }
 0x9b9   :  { %v1101_v24 = vpop.xlane.xlu1 %1100 }
 0x9ba   :  { %v1104_v25 = vsub.f32 %v1094_v16, %v1102_v23  ;;  %v1103_v26 = vmul.f32 0.0078125, %v1101_v24  ;;  %v3818_v16 = vld [vmem:[#allocation5 + $0x38] sm:$0xff]  }
 0x9bb   :  { %3394 = vmatpush3.bf16.msra.mxu0 %v3818_v16 }
 0x9bc   :  { %v1105_v27 = vsub.f32 %v1095_v18, %v1103_v26  ;;  %v1106_v28 = vmul.f32 %v1104_v25, %v1104_v25  ;;  %3563 = vmatprep.subr.bf16.mxu0 %v4194_v4  ;;  %v1153_v18 = vld [vmem:[%s4964_s11] sm:$0x3] }
 0x9bd   :  { %v1158_v20 = vrot.slane %v1153_v18, %v4455_v55  ;;  %v1162_v21 = vrot.slane %v1153_v18, %v4462_v58 }
 0x9be   :  { %1108 = vadd.xlane.f32.xlu0 %v1106_v28  ;;  %v1107_v29 = vmul.f32 %v1105_v27, %v1105_v27 }
 0x9c2   :  { %1110 = vadd.xlane.f32.xlu0 %v1107_v29 }
 0xa4b   :  { %v1109_v41 = vpop.xlane.xlu0 %1108 }
 0xa4c   :  { %v1112_v42 = vmul.f32 0.0078125, %v1109_v41 }
 0xa4e   :  { %v1114_v43 = vadd.f32 1e-12, %v1112_v42 }
 0xa4f   :  { %v1111_v44 = vpop.xlane.xlu0 %1110 }
 0xa50   :  { %3951 = vrsqrt.f32 %v1114_v43  ;;  %v1113_v45 = vmul.f32 0.0078125, %v1111_v44 }
 0xa52   :  { %v1115_v46 = vadd.f32 1e-12, %v1113_v45 }
 0xa54   :  { %3953 = vrsqrt.f32 %v1115_v46 }
 0xa5a   :  { %v3952_v47 = vpop.eup %3951 }
 0xa5b   :  { %v1118_v48 = vmul.f32 %v3952_v47, %v1104_v25 }
 0xa5d   :  { %v1126_v57 = vmul.f32 %v3174_v49, %v1118_v48 }
 0xa5e   :  { %v3954_v52 = vpop.eup %3953 }
 0xa5f   :  { %v1119_v53 = vmul.f32 %v3954_v52, %v1105_v27  ;;  %v4656_v62 = vadd.f32 %v3175_v59, %v1126_v57 }
 0xa61   :  { %v1127_v61 = vmul.f32 %v3174_v49, %v1119_v53 }
 0xa63   :  { %v4658_v0 = vadd.f32 %v3175_v59, %v1127_v61 }
 0xa65   :  { %v1136_v1 = vpack.c.bf16 %v4658_v0, %v4656_v62 }
 0xa67   :  { %1278 = vmatmul.mubr.bf16.vlgmr.msra.gmra.mrb[28].mxu1 %v1136_v1 }
 0xa68   :  { %1756 = vmatprep.mubr.bf16.mxu1 %v4195_v30 }
 0xb3a   :  { %v1279_v22 = vpop.f32.mrb[28].mxu1 }
 0xb3b   :  { %v1280_v50 = vadd.f32 %v1279_v22, %v1158_v20  ;;  %v1281_v51 = vpop.f32.mrb[29].mxu1 }
 0xb3c   :  { %v1282_v23 = vadd.f32 %v1281_v51, %v1162_v21  ;;  %v1283_v24 = vpop.f32.mrb[30].mxu1  ;;  %v3821_v51 = vld [vmem:[#allocation3 + $0xc4] ss:$12 sps:$4 sm:$0xff]  }
 0xb3d   :  { %v1288_v25 = vmul.f32 %v1280_v50, %v1280_v50  ;;  %v1284_v26 = vadd.f32 %v1283_v24, %v1158_v20  ;;  %v1285_v27 = vpop.f32.mrb[31].mxu1  ;;  %v3825_v24 = vld [vmem:[#allocation3 + $0xdc] ss:$12 sps:$4 sm:$0xff]   ;;  %1724 = vmatprep.subr.bf16.mxu1 %v3821_v51 }
 0xb3e   :  { %v1289_v28 = vmul.f32 %v1282_v23, %v1282_v23  ;;  %v1286_v29 = vadd.f32 %v1285_v27, %v1162_v21 }
 0xb3f   :  { %v1292_v31 = vmul.f32 %v1288_v25, %v1280_v50  ;;  %v1290_v32 = vmul.f32 %v1284_v26, %v1284_v26  ;;  %v3826_v25 = vld [vmem:[#allocation3 + $0xe0] ss:$12 sps:$4 sm:$0xff]  }
 0xb40   :  { %v1293_v33 = vmul.f32 %v1289_v28, %v1282_v23  ;;  %v1291_v19 = vmul.f32 %v1286_v29, %v1286_v29 }
 0xb41   :  { %v1296_v34 = vmul.f32 0.044715, %v1292_v31  ;;  %v1294_v35 = vmul.f32 %v1290_v32, %v1284_v26 }
 0xb42   :  { %v1297_v36 = vmul.f32 0.044715, %v1293_v33  ;;  %v1295_v37 = vmul.f32 %v1291_v19, %v1286_v29  ;;  %v3829_v19 = vld [vmem:[#allocation3 + $0xf4] ss:$12 sps:$4 sm:$0xff]  }
 0xb43   :  { %v1300_v38 = vadd.f32 %v1296_v34, %v1280_v50  ;;  %v1298_v39 = vmul.f32 0.044715, %v1294_v35  ;;  %v3827_v34 = vld [vmem:[#allocation3 + $0xf0] ss:$12 sps:$4 sm:$0xff]   ;;  %v3830_v35 = vld [vmem:[#allocation3 + $0xf8] ss:$12 sps:$4 sm:$0xff]  }
 0xb44   :  { %v1301_v17 = vadd.f32 %v1297_v36, %v1282_v23  ;;  %v1299_v40 = vmul.f32 0.044715, %v1295_v37  ;;  %v3833_v36 = vld [vmem:[#allocation3 + $0x10c] ss:$12 sps:$4 sm:$0xff]   ;;  %v3831_v37 = vld [vmem:[#allocation3 + $0x108] ss:$12 sps:$4 sm:$0xff]  }
 0xb45   :  { %v1304_v41 = vmul.f32 0.7978846, %v1300_v38  ;;  %v1302_v42 = vadd.f32 %v1298_v39, %v1284_v26  ;;  %v3834_v38 = vld [vmem:[#allocation3 + $0x110] ss:$12 sps:$4 sm:$0xff]  }
 0xb46   :  { %v1305_v43 = vmul.f32 0.7978846, %v1301_v17  ;;  %v1303_v44 = vadd.f32 %v1299_v40, %v1286_v29  ;;  %v3837_v39 = vld [vmem:[#allocation3 + $0x124] ss:$12 sps:$4 sm:$0xff]   ;;  %v3835_v17 = vld [vmem:[#allocation3 + $0x120] ss:$12 sps:$4 sm:$0xff]  }
 0xb47   :  { %3955 = vtanh.f32 %v1304_v41  ;;  %v1306_v45 = vmul.f32 0.7978846, %v1302_v42  ;;  %v3838_v40 = vld [vmem:[#allocation3 + $0x128] ss:$12 sps:$4 sm:$0xff]   ;;  %v3839_v42 = vld [vmem:[#allocation3 + $0x138] ss:$12 sps:$4 sm:$0xff]  }
 0xb48   :  { %3957 = vtanh.f32 %v1305_v43  ;;  %v1307_v46 = vmul.f32 0.7978846, %v1303_v44  ;;  %v3841_v41 = vld [vmem:[#allocation3 + $0x13c] ss:$12 sps:$4 sm:$0xff]   ;;  %v3842_v43 = vld [vmem:[#allocation3 + $0x140] ss:$12 sps:$4 sm:$0xff]  }
 0xb49   :  { %3959 = vtanh.f32 %v1306_v45  ;;  %v3845_v44 = vld [vmem:[#allocation3 + $0x154] ss:$12 sps:$4 sm:$0xff]   ;;  %v3843_v45 = vld [vmem:[#allocation3 + $0x150] ss:$12 sps:$4 sm:$0xff]  }
 0xb4a   :  { %3961 = vtanh.f32 %v1307_v46  ;;  %v3846_v46 = vld [vmem:[#allocation3 + $0x158] ss:$12 sps:$4 sm:$0xff]  }
 0xb51   :  { %v3956_v47 = vpop.eup %3955 }
 0xb52   :  { %v3958_v48 = vpop.eup %3957  ;;  %v1312_v49 = vadd.f32 1.0, %v3956_v47  ;;  %v3849_v47 = vld [vmem:[#allocation3 + $0x16c] ss:$12 sps:$4 sm:$0xff]  }
 0xb53   :  { %v3960_v52 = vpop.eup %3959  ;;  %v1313_v53 = vadd.f32 1.0, %v3958_v48  ;;  %v3847_v48 = vld [vmem:[#allocation3 + $0x168] ss:$12 sps:$4 sm:$0xff]  }
 0xb54   :  { %v3962_v57 = vpop.eup %3961  ;;  %v1316_v59 = vmul.f32 0.5, %v1312_v49  ;;  %v1314_v61 = vadd.f32 1.0, %v3960_v52  ;;  %v3850_v49 = vld [vmem:[#allocation3 + $0x170] ss:$12 sps:$4 sm:$0xff]  }
 0xb55   :  { %v1315_v1 = vadd.f32 1.0, %v3962_v57  ;;  %v1317_v2 = vmul.f32 0.5, %v1313_v53 }
 0xb56   :  { %v1318_v3 = vmul.f32 0.5, %v1314_v61  ;;  %v1320_v6 = vmul.f32 %v1316_v59, %v1280_v50  ;;  %v3819_v50 = vld [vmem:[#allocation3 + $0xc0] ss:$12 sps:$4 sm:$0xff]  }
 0xb57   :  { %v1319_v5 = vmul.f32 0.5, %v1315_v1  ;;  %v1321_v8 = vmul.f32 %v1317_v2, %v1282_v23  ;;  %v3822_v23 = vld [vmem:[#allocation3 + $0xc8] ss:$12 sps:$4 sm:$0xff]   ;;  %1725 = vmatpush1.bf16.msra.mxu1 %v3819_v50 }
 0xb58   :  { %v1322_v7 = vmul.f32 %v1318_v3, %v1284_v26  ;;  %v3823_v26 = vld [vmem:[#allocation3 + $0xd8] ss:$12 sps:$4 sm:$0xff]   ;;  %1726 = vmatprep.subr.bf16.mxu1 %v3825_v24  ;;  %v3209_v3 = vld [vmem:[#allocation7] ss:$0 sm:$0xff] }
 0xb59   :  { %v1323_v9 = vmul.f32 %v1319_v5, %v1286_v29 }
 0xb5a   :  { %v1324_v10 = vpack.c.bf16 %v1322_v7, %v1320_v6 }
 0xb5b   :  { %v1325_v11 = vpack.c.bf16 %v1323_v9, %v1321_v8  ;;  %1727 = vmatpush1.bf16.msra.mxu1 %v3823_v26  ;;  %v3210_v9 = vld [vmem:[#allocation8] ss:$0 sm:$0xff] }
 0xb5c   :  { %1728 = vmatprep.subr.bf16.mxu1 %v3829_v19 }
 0xb5d   :  { %1493 = vmatprep.mubr.bf16.mxu0 %v1325_v11 }
 0xb5e   :  { %1494 = vmatmul.mubr.bf16.vlgmr.msra.gmra.mrb[16].mxu0 %v1324_v10 }
 0xb5f   :  { %3579 = vmatprep.mubr.msk.bf16.mxu0 %vm4196_vm0, %v4194_v4  ;;  %3564 = vmatpush3.bf16.msra.mxu0 %v3822_v23 }
 0xb60   :  { %3565 = vmatprep.subr.bf16.mxu0 %v4194_v4  ;;  %1729 = vmatpush1.bf16.msra.mxu1 %v3827_v34 }
 0xb61   :  { %1730 = vmatprep.subr.bf16.mxu1 %v3833_v36 }
 0xb63   :  { %3566 = vmatpush3.bf16.msra.mxu0 %v3826_v25 }
 0xb64   :  { %3567 = vmatprep.subr.bf16.mxu0 %v4194_v4  ;;  %1731 = vmatpush1.bf16.msra.mxu1 %v3831_v37 }
 0xb65   :  { %1732 = vmatprep.subr.bf16.mxu1 %v3837_v39 }
 0xb67   :  { %3568 = vmatpush3.bf16.msra.mxu0 %v3830_v35  ;;  %v4720_v35 = vld [vmem:[%s4992_s24 + $0x8] sm:$0xff] }
 0xb68   :  { %3569 = vmatprep.subr.bf16.mxu0 %v4194_v4  ;;  %1733 = vmatpush1.bf16.msra.mxu1 %v3835_v17 }
 0xb69   :  { %1734 = vmatprep.subr.bf16.mxu1 %v3841_v41 }
 0xb6b   :  { %3570 = vmatpush3.bf16.msra.mxu0 %v3834_v38 }
 0xb6c   :  { %3571 = vmatprep.subr.bf16.mxu0 %v4194_v4  ;;  %1735 = vmatpush1.bf16.msra.mxu1 %v3839_v42 }
 0xb6d   :  { %1736 = vmatprep.subr.bf16.mxu1 %v3845_v44 }
 0xb6f   :  { %3572 = vmatpush3.bf16.msra.mxu0 %v3838_v40 }
 0xb70   :  { %3573 = vmatprep.subr.bf16.mxu0 %v4194_v4  ;;  %1737 = vmatpush1.bf16.msra.mxu1 %v3843_v45 }
 0xb71   :  { %1738 = vmatprep.subr.bf16.mxu1 %v3849_v47 }
 0xb73   :  { %3574 = vmatpush3.bf16.msra.mxu0 %v3842_v43 }
 0xb74   :  { %3575 = vmatprep.subr.bf16.mxu0 %v4194_v4  ;;  %1739 = vmatpush1.bf16.msra.mxu1 %v3847_v48 }
 0xb75   :  { %3583 = vmatprep.subr.bf16.mxu1 %v4194_v4 }
 0xb77   :  { %3576 = vmatpush3.bf16.msra.mxu0 %v3846_v46 }
 0xb78   :  { %3577 = vmatprep.subr.bf16.mxu0 %v4194_v4 }
 0xb7b   :  { %3578 = vmatpush3.bf16.msra.mxu0 %v3850_v49 }
 0xb7c   :  { %3607 = vmatprep.subr.bf16.mxu0 %v4194_v4 }
 0xc31   :  { %v3395_v63 = vpop.f32.mrb[16].mxu0 }
 0xc32   :  { %v3396_v14 = vpop.f32.mrb[17].mxu0 }
 0xc33   :  { %v3397_v60 = vadd.f32 %v3396_v14, %v3395_v63  ;;  %v3398_v13 = vpop.f32.mrb[18].mxu0  ;;  %v3211_v14 = vld [vmem:[%s4958_s5 + $0x3] sm:$0x7] }
 0xc34   :  { %v3399_v15 = vpop.f32.mrb[19].mxu0 }
 0xc35   :  { %v1496_v16 = vadd.f32 %v3397_v60, %v3192_v12  ;;  %v3400_v18 = vadd.f32 %v3399_v15, %v3398_v13  ;;  %v1584_v60 = vrot.slane %v3211_v14, %v4455_v55  ;;  %v1592_v13 = vrot.slane %v3211_v14, %v247_v56 }
 0xc37   :  { %v1499_v20 = vadd.f32 %v3400_v18, %v3192_v12  ;;  %v1502_v21 = vadd.f32 %v1496_v16, %v4656_v62  ;;  %v1588_v18 = vrot.slane %v3211_v14, %v4462_v58 }
 0xc39   :  { %1506 = vadd.xlane.f32.xlu0 %v1502_v21  ;;  %v1503_v22 = vadd.f32 %v1499_v20, %v4658_v0 }
 0xc3b   :  { %1508 = vadd.xlane.f32.xlu1 %v1503_v22 }
 0xcc6   :  { %v1507_v62 = vpop.xlane.xlu0 %1506 }
 0xcc7   :  { %v1510_v27 = vmul.f32 0.0078125, %v1507_v62 }
 0xcc8   :  { %v1509_v0 = vpop.xlane.xlu1 %1508 }
 0xcc9   :  { %v1512_v28 = vsub.f32 %v1502_v21, %v1510_v27  ;;  %v1511_v29 = vmul.f32 0.0078125, %v1509_v0 }
 0xccb   :  { %v1513_v31 = vsub.f32 %v1503_v22, %v1511_v29  ;;  %v1514_v32 = vmul.f32 %v1512_v28, %v1512_v28 }
 0xccd   :  { %1516 = vadd.xlane.f32.xlu0 %v1514_v32  ;;  %v1515_v33 = vmul.f32 %v1513_v31, %v1513_v31  ;;  %v4714_v32 = vld [vmem:[%s4992_s24] sm:$0xff] }
 0xccf   :  { %1518 = vadd.xlane.f32.xlu1 %v1515_v33 }
 0xd5a   :  { %v1517_v52 = vpop.xlane.xlu0 %1516 }
 0xd5b   :  { %v1520_v53 = vmul.f32 0.0078125, %v1517_v52 }
 0xd5c   :  { %v1519_v57 = vpop.xlane.xlu1 %1518 }
 0xd5d   :  { %v1522_v59 = vadd.f32 1e-12, %v1520_v53  ;;  %v1521_v61 = vmul.f32 0.0078125, %v1519_v57 }
 0xd5f   :  { %3963 = vrsqrt.f32 %v1522_v59  ;;  %v1523_v1 = vadd.f32 1e-12, %v1521_v61 }
 0xd61   :  { %3965 = vrsqrt.f32 %v1523_v1 }
 0xd69   :  { %v3964_v2 = vpop.eup %3963 }
 0xd6a   :  { %v1526_v5 = vmul.f32 %v3964_v2, %v1512_v28 }
 0xd6b   :  { %v3966_v6 = vpop.eup %3965 }
 0xd6c   :  { %v1527_v7 = vmul.f32 %v3966_v6, %v1513_v31  ;;  %v1534_v8 = vmul.f32 %v3209_v3, %v1526_v5 }
 0xd6e   :  { %v1535_v10 = vmul.f32 %v3209_v3, %v1527_v7  ;;  %v4685_v11 = vadd.f32 %v3210_v9, %v1534_v8 }
 0xd70   :  { %v4687_v63 = vadd.f32 %v3210_v9, %v1535_v10 }
 0xd72   :  { %v1544_v12 = vpack.c.bf16 %v4687_v63, %v4685_v11 }
 0xd74   :  { %1757 = vmatmul.mubr.bf16.vlgmr.msra.gmra.mrb[32].mxu1 %v1544_v12  ;;  %3580 = vmatmul.mubr.bf16.vlgmr.msra.gmra.mrb[20].mxu0 %v1544_v12 }
 0xd75   :  { %3585 = vmatprep.mubr.msk.bf16.mxu1 %vm4196_vm0, %v4194_v4  ;;  %3609 = vmatprep.mubr.msk.bf16.mxu0 %vm4196_vm0, %v4194_v4 }
 0xe47   :  { %v1758_v15 = vpop.f32.mrb[32].mxu1  ;;  %v1801_v16 = vpop.f32.mrb[20].mxu0 }
 0xe48   :  { %v1760_v20 = vpop.f32.mrb[33].mxu1  ;;  %v3581_v21 = vpop.f32.mrb[21].mxu0  ;;  %v1759_v51 = vadd.f32 %v1758_v15, %v1584_v60  ;;  %v1802_v23 = vadd.f32 %v1801_v16, %v1592_v13 }
 0xe49   :  { %v1762_v22 = vpop.f32.mrb[34].mxu1  ;;  %v1804_v50 = vpop.f32.mrb[22].mxu0  ;;  %v1761_v27 = vadd.f32 %v1760_v20, %v1588_v18 }
 0xe4a   :  { %v1763_v24 = vadd.f32 %v1762_v22, %v1584_v60  ;;  %v1805_v25 = vadd.f32 %v1804_v50, %v1592_v13  ;;  %v1764_v26 = vpop.f32.mrb[35].mxu1  ;;  %v3582_v62 = vpop.f32.mrb[23].mxu0 }
 0xe4b   :  { %v1765_v0 = vadd.f32 %v1764_v26, %v1588_v18 }
 0xe4c   :  { %v1808_v28 = vpack.c.bf16 %v1763_v24, %v1759_v51  ;;  %v4702_v29 = vpack.c.bf16 %v1805_v25, %v1802_v23 }
 0xe4d   :  { %v1809_v54 = vpack.c.bf16 %v1765_v0, %v1761_v27 }
 0xe4f   :  { %v1815_v56 = vsel %vm467_vm1, %v1809_v54, 0 }
 0xe50   :  { %3584 = vmatpush3.bf16.xpose.msra.mxu1 %v1815_v56 }
 0xe51   :  { %3589 = vmatprep.subr.bf16.mxu1 %v4194_v4 }
 0xe57   :  { %3586 = vmatmul.mubr.msk.bf16.vlgmr.msra.gmra.mrb[36].mxu1 %vm467_vm1, %v1808_v28 }
 0xe58   :  { %3590 = vmatpush3.bf16.msra.mxu1 %v4702_v29  ;;  %3591 = vmatprep.mubr.msk.bf16.mxu1 %vm4196_vm0, %v4194_v4 }
 0xe59   :  { %3595 = vmatprep.subr.bf16.mxu1 %v4194_v4 }
 0xf2a   :  { %v1851_v31 = vpop.f32.mrb[36].mxu1 }
 0xf2b   :  { %v1852_v33 = vadd.f32 %v4714_v32, %v1851_v31  ;;  %v3587_v19 = vpop.f32.mrb[37].mxu1 }
 0xf2c   :  { %v1854_v34 = vpop.f32.mrb[38].mxu1 }
 0xf2d   :  { %v1855_v36 = vadd.f32 %v4720_v35, %v1854_v34  ;;  %v3588_v37 = vpop.f32.mrb[39].mxu1  ;;  %v1858_v38 = vsel %vm515_vm2, %v1852_v33, -inf }
 0xf2e   :  { %1859 = vmax.xlane.f32.xlu0 %v1858_v38 }
 0xf2f   :  { %v1861_v39 = vsel %vm515_vm2, %v1855_v36, -inf }
 0xf30   :  { %1862 = vmax.xlane.f32.xlu1 %v1861_v39 }
 0xfbb   :  { %v1860_v17 = vpop.xlane.xlu0 %1859 }
 0xfbc   :  { %v1864_v40 = vsub.f32 %v1852_v33, %v1860_v17 }
 0xfbd   :  { %v1863_v41 = vpop.xlane.xlu1 %1862 }
 0xfbe   :  { %v1866_v42 = vmul.f32 1.442695, %v1864_v40  ;;  %v1865_v43 = vsub.f32 %v1855_v36, %v1863_v41 }
 0xfc0   :  { %3967 = vpow2.f32 %v1866_v42  ;;  %v1868_v44 = vmul.f32 1.442695, %v1865_v43 }
 0xfc2   :  { %3969 = vpow2.f32 %v1868_v44 }
 0xfca   :  { %v3968_v45 = vpop.eup %3967 }
 0xfcb   :  { %v1870_v46 = vsel %vm515_vm2, %v3968_v45, 0.0 }
 0xfcc   :  { %v3970_v47 = vpop.eup %3969  ;;  %1871 = vadd.xlane.f32.xlu0 %v1870_v46 }
 0xfcd   :  { %v1873_v48 = vsel %vm515_vm2, %v3970_v47, 0.0 }
 0xfce   :  { %1874 = vadd.xlane.f32.xlu1 %v1873_v48 }
 0xfdf   :  { %1926 = vrot.lane.b32.xlu1 %v1808_v28, %s4197_s16 }
 0xfe2   :  { %1929 = vrot.lane.b32.xlu0 %v1809_v54, %s4197_s16 }
 0xfe3   :  { %2051 = vrot.lane.b32.xlu1 %v1809_v54, %s4988_s22 }
 0xfe6   :  { %2172 = vrot.lane.b32.xlu0 %v1809_v54, %s4198_s3 }
 0xfe7   :  { %2049 = vrot.lane.b32.xlu1 %v1808_v28, %s4988_s22 }
 0xfeb   :  { %2170 = vrot.lane.b32.xlu1 %v1808_v28, %s4198_s3 }
0x1059   :  { %v1872_v49 = vpop.xlane.xlu0 %1871 }
0x105a   :  { %3971 = vrcp.f32 %v1872_v49 }
0x105b   :  { %v1875_v52 = vpop.xlane.xlu1 %1874 }
0x105c   :  { %3973 = vrcp.f32 %v1875_v52 }
0x105d   :  { %v1930_v57 = vpop.permute.xlu0 %1929 }
0x105e   :  { %v1935_v8 = vsel %vm467_vm1, %v1930_v57, 0 }
0x105f   :  { %v1927_v53 = vpop.permute.xlu1 %1926 }
0x1061   :  { %v2173_v6 = vpop.permute.xlu0 %2172 }
0x1062   :  { %v2178_v10 = vsel %vm467_vm1, %v2173_v6, 0 }
0x1063   :  { %v2052_v59 = vpop.permute.xlu1 %2051 }
0x1064   :  { %v3972_v61 = vpop.eup %3971  ;;  %v2057_v1 = vsel %vm467_vm1, %v2052_v59, 0 }
0x1065   :  { %3608 = vmatpush3.bf16.xpose.msra.mxu0 %v2057_v1  ;;  %v1878_v3 = vmul.f32 %v3972_v61, %v3968_v45 }
0x1066   :  { %v3974_v2 = vpop.eup %3973  ;;  %3619 = vmatprep.subr.bf16.mxu0 %v4194_v4 }
0x1067   :  { %v1879_v5 = vmul.f32 %v3974_v2, %v3970_v47  ;;  %v2050_v9 = vpop.permute.xlu1 %2049 }
0x1069   :  { %v1880_v7 = vpack.c.bf16 %v1879_v5, %v1878_v3 }
0x106b   :  { %3592 = vmatmul.mubr.msk.bf16.vlgmr.msra.gmra.mrb[40].mxu1 %vm515_vm2, %v1880_v7  ;;  %v2171_v12 = vpop.permute.xlu1 %2170 }
0x106c   :  { %3596 = vmatpush3.bf16.xpose.msra.mxu1 %v1935_v8  ;;  %3610 = vmatmul.mubr.msk.bf16.vlgmr.msra.gmra.mrb[24].mxu0 %vm467_vm1, %v2050_v9 }
0x106d   :  { %3620 = vmatpush3.bf16.xpose.msra.mxu0 %v2178_v10  ;;  %3597 = vmatprep.mubr.msk.bf16.mxu1 %vm4196_vm0, %v4194_v4 }
0x106e   :  { %3621 = vmatprep.mubr.msk.bf16.mxu0 %vm4196_vm0, %v4194_v4  ;;  %3601 = vmatprep.subr.bf16.mxu1 %v4194_v4 }
0x106f   :  { %3631 = vmatprep.subr.bf16.mxu0 %v4194_v4 }
0x1073   :  { %3598 = vmatmul.mubr.msk.bf16.vlgmr.msra.gmra.mrb[44].mxu1 %vm467_vm1, %v1927_v53 }
0x1074   :  { %3622 = vmatmul.mubr.msk.bf16.vlgmr.msra.gmra.mrb[28].mxu0 %vm467_vm1, %v2171_v12  ;;  %3603 = vmatprep.mubr.msk.bf16.mxu1 %vm4196_vm0, %v4194_v4 }
0x1075   :  { %3647 = vmatprep.mubr.msk.bf16.mxu0 %vm4196_vm0, %v4194_v4 }
0x113e   :  { %v4751_v14 = vpop.f32.mrb[40].mxu1 }
0x113f   :  { %v3593_v60 = vpop.f32.mrb[41].mxu1  ;;  %v2093_v13 = vpop.f32.mrb[24].mxu0 }
0x1140   :  { %v4753_v15 = vpop.f32.mrb[42].mxu1  ;;  %v3611_v16 = vpop.f32.mrb[25].mxu0  ;;  %v2094_v26 = vadd.f32 %v4714_v32, %v2093_v13 }
0x1141   :  { %v3594_v18 = vpop.f32.mrb[43].mxu1  ;;  %v2096_v20 = vpop.f32.mrb[26].mxu0 }
0x1142   :  { %v3612_v21 = vpop.f32.mrb[27].mxu0  ;;  %v2097_v33 = vadd.f32 %v4720_v35, %v2096_v20  ;;  %v2100_v19 = vsel %vm515_vm2, %v2094_v26, -inf }
0x1144   :  { %v2103_v37 = vsel %vm515_vm2, %v2097_v33, -inf }
0x1146   :  { %v1971_v22 = vpop.f32.mrb[44].mxu1 }
0x1147   :  { %v1972_v50 = vadd.f32 %v4714_v32, %v1971_v22  ;;  %v3599_v51 = vpop.f32.mrb[45].mxu1  ;;  %v2214_v23 = vpop.f32.mrb[28].mxu0 }
0x1148   :  { %v1974_v24 = vpop.f32.mrb[46].mxu1  ;;  %v3623_v25 = vpop.f32.mrb[29].mxu0  ;;  %v2215_v36 = vadd.f32 %v4714_v32, %v2214_v23 }
0x1149   :  { %v1975_v62 = vadd.f32 %v4720_v35, %v1974_v24  ;;  %v3600_v27 = vpop.f32.mrb[47].mxu1  ;;  %v2217_v0 = vpop.f32.mrb[30].mxu0  ;;  %v1978_v28 = vsel %vm515_vm2, %v1972_v50, -inf }
0x114a   :  { %v3624_v54 = vpop.f32.mrb[31].mxu0  ;;  %1979 = vmax.xlane.f32.xlu0 %v1978_v28  ;;  %v2218_v56 = vadd.f32 %v4720_v35, %v2217_v0  ;;  %v2221_v38 = vsel %vm515_vm2, %v2215_v36, -inf }
0x114b   :  { %v1981_v31 = vsel %vm515_vm2, %v1975_v62, -inf }
0x114c   :  { %1982 = vmax.xlane.f32.xlu1 %v1981_v31  ;;  %v2224_v34 = vsel %vm515_vm2, %v2218_v56, -inf }
0x114e   :  { %2101 = vmax.xlane.f32.xlu0 %v2100_v19 }
0x1150   :  { %2225 = vmax.xlane.f32.xlu1 %v2224_v34 }
0x1152   :  { %2104 = vmax.xlane.f32.xlu0 %v2103_v37  ;;  %v3851_v37 = vld [vmem:[%s4959_s6 + $0x40] sm:$0xff]  }
0x1153   :  { %3632 = vmatpush3.bf16.msra.mxu0 %v3851_v37  ;;  %v3865_v37 = vld [vmem:[%s4963_s10 + $0xa0] ss:$8 sps:$4 sm:$0xff]  }
0x1154   :  { %3633 = vmatprep.subr.bf16.mxu0 %v4194_v4 }
0x1156   :  { %2222 = vmax.xlane.f32.xlu0 %v2221_v38  ;;  %v3852_v38 = vld [vmem:[%s4959_s6 + $0x48] sm:$0xff]  }
0x1157   :  { %3634 = vmatpush3.bf16.msra.mxu0 %v3852_v38  ;;  %v3870_v38 = vld [vmem:[%s4963_s10 + $0xb4] ss:$8 sps:$4 sm:$0xff]  }
0x1158   :  { %3635 = vmatprep.subr.bf16.mxu0 %v4194_v4 }
0x11d7   :  { %v1980_v39 = vpop.xlane.xlu0 %1979 }
0x11d8   :  { %v1984_v46 = vsub.f32 %v1972_v50, %v1980_v39  ;;  %v3853_v39 = vld [vmem:[%s4959_s6 + $0x50] sm:$0xff]  }
0x11d9   :  { %v1983_v17 = vpop.xlane.xlu1 %1982  ;;  %3636 = vmatpush3.bf16.msra.mxu0 %v3853_v39  ;;  %v3868_v39 = vld [vmem:[%s4963_s10 + $0xb0] ss:$8 sps:$4 sm:$0xff]  }
0x11da   :  { %v1985_v47 = vsub.f32 %v1975_v62, %v1983_v17  ;;  %v1986_v53 = vmul.f32 1.442695, %v1984_v46  ;;  %3637 = vmatprep.subr.bf16.mxu0 %v4194_v4  ;;  %v3855_v17 = vld [vmem:[%s4959_s6 + $0x60] sm:$0xff]  }
0x11db   :  { %v2102_v40 = vpop.xlane.xlu0 %2101 }
0x11dc   :  { %v2106_v41 = vsub.f32 %v2094_v26, %v2102_v40  ;;  %v1988_v57 = vmul.f32 1.442695, %v1985_v47 }
0x11dd   :  { %v2226_v42 = vpop.xlane.xlu1 %2225 }
0x11de   :  { %v2108_v35 = vmul.f32 1.442695, %v2106_v41  ;;  %v2228_v43 = vsub.f32 %v2218_v56, %v2226_v42  ;;  %v3856_v42 = vld [vmem:[%s4959_s6 + $0x68] sm:$0xff]  }
0x11df   :  { %v2105_v44 = vpop.xlane.xlu0 %2104 }
0x11e0   :  { %3975 = vpow2.f32 %v2108_v35  ;;  %v2107_v45 = vsub.f32 %v2097_v33, %v2105_v44  ;;  %v2231_v48 = vmul.f32 1.442695, %v2228_v43 }
0x11e2   :  { %v2110_v32 = vmul.f32 1.442695, %v2107_v45  ;;  %v3857_v45 = vld [vmem:[%s4959_s6 + $0x70] sm:$0xff]  }
0x11e3   :  { %v2223_v49 = vpop.xlane.xlu0 %2222 }
0x11e4   :  { %3977 = vpow2.f32 %v2110_v32  ;;  %v2227_v52 = vsub.f32 %v2215_v36, %v2223_v49 }
0x11e5   :  { %3979 = vpow2.f32 %v2231_v48  ;;  %v3858_v48 = vld [vmem:[%s4959_s6 + $0x78] sm:$0xff]  }
0x11e6   :  { %v2229_v59 = vmul.f32 1.442695, %v2227_v52 }
0x11e8   :  { %3981 = vpow2.f32 %v2229_v59 }
0x11e9   :  { %3983 = vpow2.f32 %v1986_v53 }
0x11ea   :  { %v3976_v61 = vpop.eup %3975  ;;  %3985 = vpow2.f32 %v1988_v57 }
0x11eb   :  { %v2112_v1 = vsel %vm515_vm2, %v3976_v61, 0.0 }
0x11ec   :  { %2113 = vadd.xlane.f32.xlu0 %v2112_v1 }
0x11ee   :  { %v3978_v2 = vpop.eup %3977 }
0x11ef   :  { %v2115_v3 = vsel %vm515_vm2, %v3978_v2, 0.0  ;;  %v3980_v5 = vpop.eup %3979 }
0x11f0   :  { %2116 = vadd.xlane.f32.xlu1 %v2115_v3  ;;  %v2236_v9 = vsel %vm515_vm2, %v3980_v5, 0.0 }
0x11f2   :  { %v3982_v6 = vpop.eup %3981 }
0x11f3   :  { %v3984_v7 = vpop.eup %3983  ;;  %v2233_v8 = vsel %vm515_vm2, %v3982_v6, 0.0 }
0x11f4   :  { %v3986_v10 = vpop.eup %3985  ;;  %2234 = vadd.xlane.f32.xlu0 %v2233_v8  ;;  %2237 = vadd.xlane.f32.xlu1 %v2236_v9  ;;  %v1990_v12 = vsel %vm515_vm2, %v3984_v7, 0.0 }
0x11f5   :  { %v1993_v60 = vsel %vm515_vm2, %v3986_v10, 0.0 }
0x11f8   :  { %1991 = vadd.xlane.f32.xlu0 %v1990_v12  ;;  %1994 = vadd.xlane.f32.xlu1 %v1993_v60 }
0x1209   :  { %2123 = vrot.lane.b32.xlu1 %v4702_v29, %s4988_s22 }
0x120d   :  { %2244 = vrot.lane.b32.xlu1 %v4702_v29, %s4198_s3 }
0x120e   :  { %2002 = vrot.lane.b32.xlu0 %v4702_v29, %s4197_s16 }
0x1279   :  { %v2114_v13 = vpop.xlane.xlu0 %2113 }
0x127d   :  { %v2117_v16 = vpop.xlane.xlu1 %2116 }
0x1281   :  { %v2235_v18 = vpop.xlane.xlu0 %2234  ;;  %v2238_v20 = vpop.xlane.xlu1 %2237 }
0x1285   :  { %v1992_v21 = vpop.xlane.xlu0 %1991  ;;  %v1995_v22 = vpop.xlane.xlu1 %1994 }
0x1286   :  { %3987 = vrcp.f32 %v1992_v21 }
0x1287   :  { %3989 = vrcp.f32 %v1995_v22 }
0x1288   :  { %3991 = vrcp.f32 %v2117_v16 }
0x1289   :  { %v2003_v50 = vpop.permute.xlu0 %2002  ;;  %3993 = vrcp.f32 %v2114_v13  ;;  %v2124_v62 = vpop.permute.xlu1 %2123 }
0x128a   :  { %3602 = vmatpush3.bf16.msra.mxu1 %v2003_v50  ;;  %3995 = vrcp.f32 %v2235_v18  ;;  %v3261_v50 = vld [vmem:[%s4960_s7 + $0x1] ss:$0 sm:$0xff] }
0x128b   :  { %3613 = vmatprep.subr.bf16.mxu1 %v4194_v4  ;;  %3997 = vrcp.f32 %v2238_v20 }
0x128d   :  { %v2245_v33 = vpop.permute.xlu1 %2244 }
0x1290   :  { %v3988_v51 = vpop.eup %3987 }
0x1291   :  { %v3990_v23 = vpop.eup %3989  ;;  %v1998_v24 = vmul.f32 %v3988_v51, %v3984_v7 }
0x1292   :  { %v1999_v25 = vmul.f32 %v3990_v23, %v3986_v10  ;;  %v3992_v26 = vpop.eup %3991 }
0x1293   :  { %v3994_v27 = vpop.eup %3993  ;;  %v2121_v0 = vmul.f32 %v3992_v26, %v3978_v2 }
0x1294   :  { %v2000_v29 = vpack.c.bf16 %v1999_v25, %v1998_v24  ;;  %v2120_v28 = vmul.f32 %v3994_v27, %v3976_v61  ;;  %v3996_v54 = vpop.eup %3995  ;;  %v3861_v27 = vld [vmem:[%s4963_s10 + $0x84] ss:$8 sps:$4 sm:$0xff]  }
0x1295   :  { %v3998_v31 = vpop.eup %3997  ;;  %v2241_v19 = vmul.f32 %v3996_v54, %v3982_v6 }
0x1296   :  { %3604 = vmatmul.mubr.msk.bf16.vlgmr.msra.gmra.mrb[48].mxu1 %vm515_vm2, %v2000_v29  ;;  %v2122_v56 = vpack.c.bf16 %v2121_v0, %v2120_v28  ;;  %v2242_v34 = vmul.f32 %v3998_v31, %v3980_v5  ;;  %v3864_v0 = vld [vmem:[%s4963_s10 + $0x94] ss:$8 sps:$4 sm:$0xff]  }
0x1297   :  { %3614 = vmatpush3.bf16.msra.mxu1 %v2124_v62  ;;  %3615 = vmatprep.mubr.msk.bf16.mxu1 %vm4196_vm0, %v4194_v4  ;;  %v3859_v62 = vld [vmem:[%s4963_s10 + $0x80] ss:$8 sps:$4 sm:$0xff]  }
0x1298   :  { %3625 = vmatprep.subr.bf16.mxu1 %v4194_v4  ;;  %v2243_v36 = vpack.c.bf16 %v2242_v34, %v2241_v19 }
0x129e   :  { %3616 = vmatmul.mubr.msk.bf16.vlgmr.msra.gmra.mrb[52].mxu1 %vm515_vm2, %v2122_v56 }
0x129f   :  { %3626 = vmatpush3.bf16.msra.mxu1 %v2245_v33  ;;  %3627 = vmatprep.mubr.msk.bf16.mxu1 %vm4196_vm0, %v4194_v4 }
0x12a0   :  { %2591 = vmatprep.subr.bf16.mxu1 %v3861_v27 }
0x12a6   :  { %3628 = vmatmul.mubr.msk.bf16.vlgmr.msra.gmra.mrb[56].mxu1 %vm515_vm2, %v2243_v36  ;;  %v3867_v36 = vld [vmem:[%s4963_s10 + $0xa4] ss:$8 sps:$4 sm:$0xff]  }
0x12a7   :  { %2623 = vmatprep.mubr.bf16.mxu1 %v4195_v30  ;;  %v3854_v30 = vld [vmem:[%s4959_s6 + $0x58] sm:$0xff]   ;;  %2592 = vmatpush1.bf16.msra.mxu1 %v3859_v62 }
0x12a8   :  { %3638 = vmatpush3.bf16.msra.mxu0 %v3854_v30  ;;  %2593 = vmatprep.subr.bf16.mxu1 %v3864_v0  ;;  %v3873_v30 = vld [vmem:[%s4963_s10 + $0xc4] ss:$8 sps:$4 sm:$0xff]  }
0x12a9   :  { %3639 = vmatprep.subr.bf16.mxu0 %v4194_v4 }
0x12ac   :  { %3640 = vmatpush3.bf16.msra.mxu0 %v3855_v17  ;;  %v3871_v17 = vld [vmem:[%s4963_s10 + $0xc0] ss:$8 sps:$4 sm:$0xff]  }
0x12ad   :  { %3641 = vmatprep.subr.bf16.mxu0 %v4194_v4 }
0x12b0   :  { %3642 = vmatpush3.bf16.msra.mxu0 %v3856_v42  ;;  %v3879_v42 = vld [vmem:[%s4963_s10 + $0xe4] ss:$8 sps:$4 sm:$0xff]  }
0x12b1   :  { %3643 = vmatprep.subr.bf16.mxu0 %v4194_v4 }
0x12b4   :  { %3644 = vmatpush3.bf16.msra.mxu0 %v3857_v45 }
0x12b5   :  { %3645 = vmatprep.subr.bf16.mxu0 %v4194_v4 }
0x12b8   :  { %3646 = vmatpush3.bf16.msra.mxu0 %v3858_v48 }
0x1369   :  { %v2042_v40 = vpop.f32.mrb[48].mxu1 }
0x136a   :  { %v3605_v41 = vpop.f32.mrb[49].mxu1 }
0x136b   :  { %v2045_v35 = vpop.f32.mrb[50].mxu1  ;;  %v3874_v41 = vld [vmem:[%s4963_s10 + $0xd0] ss:$8 sps:$4 sm:$0xff]  }
0x136c   :  { %v3724_v43 = vpack.i.bf16 %v2045_v35, %v2042_v40  ;;  %v3606_v44 = vpop.f32.mrb[51].mxu1  ;;  %v3876_v40 = vld [vmem:[%s4963_s10 + $0xd4] ss:$8 sps:$4 sm:$0xff]   ;;  %v3877_v35 = vld [vmem:[%s4963_s10 + $0xe0] ss:$8 sps:$4 sm:$0xff]  }
0x136d   :  { %v3880_v44 = vld [vmem:[%s4963_s10 + $0xf0] ss:$8 sps:$4 sm:$0xff]  }
0x136e   :  { %3725 = vrot.lane.b32.xlu1 %v3724_v43, %s4198_s3  ;;  %v3882_v43 = vld [vmem:[%s4963_s10 + $0xf4] ss:$8 sps:$4 sm:$0xff]  }
0x1371   :  { %v2163_v46 = vpop.f32.mrb[52].mxu1 }
0x1372   :  { %v3617_v47 = vpop.f32.mrb[53].mxu1 }
0x1373   :  { %v2166_v32 = vpop.f32.mrb[54].mxu1 }
0x1374   :  { %v3729_v49 = vpack.i.bf16 %v2166_v32, %v2163_v46  ;;  %v3618_v52 = vpop.f32.mrb[55].mxu1 }
0x1376   :  { %3730 = vrot.lane.b32.xlu0 %v3729_v49, %s4988_s22 }
0x1379   :  { %v2284_v53 = vpop.f32.mrb[56].mxu1 }
0x137a   :  { %v3629_v57 = vpop.f32.mrb[57].mxu1 }
0x137b   :  { %v2287_v59 = vpop.f32.mrb[58].mxu1  ;;  %v3272_v57 = vld [vmem:[%s4961_s8 + $0x1] ss:$0 sm:$0xff] }
0x137c   :  { %v3734_v61 = vpack.i.bf16 %v2287_v59, %v2284_v53  ;;  %v3630_v1 = vpop.f32.mrb[59].mxu1 }
0x137e   :  { %3735 = vrot.lane.b32.xlu1 %v3734_v61, %s4197_s16 }
0x13e0   :  { %v3726_v2 = vpop.permute.xlu1 %3725 }
0x13e1   :  { %v3728_v5 = vunpack.i.h.bf16 %v3726_v2  ;;  %v3727_v6 = vunpack.i.l.bf16 %v3726_v2  ;;  %v3273_v2 = vld [vmem:[%s4962_s9 + $0x1] ss:$0 sm:$0xff] }
0x13e3   :  { %v2316_v10 = vsel %vm467_vm1, %v4753_v15, %v3728_v5  ;;  %v2315_v12 = vsel %vm467_vm1, %v4751_v14, %v3727_v6 }
0x13e8   :  { %v3731_v3 = vpop.permute.xlu0 %3730 }
0x13e9   :  { %v3733_v7 = vunpack.i.h.bf16 %v3731_v3  ;;  %v3732_v8 = vunpack.i.l.bf16 %v3731_v3 }
0x13eb   :  { %v2318_v16 = vsel %vm975_vm3, %v2316_v10, %v3733_v7  ;;  %v2317_v18 = vsel %vm975_vm3, %v2315_v12, %v3732_v8  ;;  %v3883_v8 = vld [vmem:[#allocation5 + $0xc0] sm:$0xff]   ;;  %v3885_v10 = vld [vmem:[#allocation5 + $0xc8] sm:$0xff]  }
0x13ec   :  { %3435 = vmatprep.subr.bf16.mxu0 %v3883_v8  ;;  %v3886_v12 = vld [vmem:[#allocation5 + $0x88] sm:$0xff]  }
0x13f0   :  { %v3736_v9 = vpop.permute.xlu1 %3735 }
0x13f1   :  { %v3738_v60 = vunpack.i.h.bf16 %v3736_v9  ;;  %v3737_v13 = vunpack.i.l.bf16 %v3736_v9  ;;  %v3884_v9 = vld [vmem:[#allocation5 + $0x80] sm:$0xff]  }
0x13f3   :  { %v2320_v20 = vsel %vm978_vm4, %v2318_v16, %v3738_v60  ;;  %v2319_v21 = vsel %vm978_vm4, %v2317_v18, %v3737_v13  ;;  %v3887_v60 = vld [vmem:[#allocation5 + $0xd0] sm:$0xff]   ;;  %v3889_v16 = vld [vmem:[#allocation5 + $0xd8] sm:$0xff]  }
0x13f4   :  { %v2321_v22 = vpack.c.bf16 %v2320_v20, %v2319_v21  ;;  %v3888_v13 = vld [vmem:[#allocation5 + $0x90] sm:$0xff]   ;;  %v3890_v18 = vld [vmem:[#allocation5 + $0x98] sm:$0xff]   ;;  %v3891_v20 = vld [vmem:[#allocation5 + $0xe0] sm:$0xff]  }
0x13f5   :  { %v3892_v21 = vld [vmem:[#allocation5 + $0xa0] sm:$0xff]  }
0x13f6   :  { %3648 = vmatmul.mubr.bf16.vlgmr.msra.gmra.mrb[32].mxu0 %v2321_v22  ;;  %v3893_v22 = vld [vmem:[#allocation5 + $0xe8] sm:$0xff]  }
0x13f7   :  { %3436 = vmatpush3.bf16.msra.mxu0 %v3884_v9 }
0x13f8   :  { %3437 = vmatprep.subr.bf16.mxu0 %v3885_v10 }
0x13fb   :  { %3438 = vmatpush3.bf16.msra.mxu0 %v3886_v12 }
0x13fc   :  { %3439 = vmatprep.subr.bf16.mxu0 %v3887_v60 }
0x13ff   :  { %3440 = vmatpush3.bf16.msra.mxu0 %v3888_v13  ;;  %v3308_v13 = vld [vmem:[%s4966_s13 + $0x1] ss:$0 sm:$0xff] }
0x1400   :  { %3441 = vmatprep.subr.bf16.mxu0 %v3889_v16 }
0x1403   :  { %3442 = vmatpush3.bf16.msra.mxu0 %v3890_v18 }
0x1404   :  { %3443 = vmatprep.subr.bf16.mxu0 %v3891_v20 }
0x1407   :  { %3444 = vmatpush3.bf16.msra.mxu0 %v3892_v21 }
0x1408   :  { %3445 = vmatprep.subr.bf16.mxu0 %v3893_v22 }
0x14c9   :  { %v2429_v15 = vpop.f32.mrb[32].mxu0 }
0x14ca   :  { %v2430_v51 = vadd.f32 %v3261_v50, %v2429_v15  ;;  %v3649_v23 = vpop.f32.mrb[33].mxu0  ;;  %v3895_v15 = vld [vmem:[#allocation5 + $0xf0] sm:$0xff]  }
0x14cb   :  { %v2432_v14 = vpop.f32.mrb[34].mxu0  ;;  %v3897_v23 = vld [vmem:[#allocation5 + $0xf8] sm:$0xff]  }
0x14cc   :  { %v2433_v24 = vadd.f32 %v3261_v50, %v2432_v14  ;;  %v3650_v25 = vpop.f32.mrb[35].mxu0  ;;  %v2436_v29 = vadd.f32 %v2430_v51, %v4685_v11  ;;  %v3862_v11 = vld [vmem:[%s4963_s10 + $0x90] ss:$8 sps:$4 sm:$0xff]   ;;  %v3896_v51 = vld [vmem:[#allocation5 + $0xb0] sm:$0xff]   ;;  %v3898_v14 = vld [vmem:[#allocation5 + $0xb8] sm:$0xff]  }
0x14cd   :  { %2594 = vmatpush1.bf16.msra.mxu1 %v3862_v11  ;;  %v3894_v50 = vld [vmem:[#allocation5 + $0xa8] sm:$0xff]  }
0x14ce   :  { %2442 = vadd.xlane.f32.xlu0 %v2436_v29  ;;  %v2437_v26 = vadd.f32 %v2433_v24, %v4687_v63  ;;  %2595 = vmatprep.subr.bf16.mxu1 %v3867_v36  ;;  %v3290_v24 = vld [vmem:[%s4964_s11 + $0x2] sm:$0x3] }
0x14cf   :  { %3446 = vmatpush3.bf16.msra.mxu0 %v3894_v50  ;;  %v2504_v25 = vrot.slane %v3290_v24, %v4455_v55 }
0x14d0   :  { %2444 = vadd.xlane.f32.xlu1 %v2437_v26  ;;  %3447 = vmatprep.subr.bf16.mxu0 %v3895_v15 }
0x14d1   :  { %2596 = vmatpush1.bf16.msra.mxu1 %v3865_v37 }
0x14d2   :  { %2597 = vmatprep.subr.bf16.mxu1 %v3870_v38 }
0x14d3   :  { %3448 = vmatpush3.bf16.msra.mxu0 %v3896_v51 }
0x14d4   :  { %3449 = vmatprep.subr.bf16.mxu0 %v3897_v23 }
0x14d5   :  { %2598 = vmatpush1.bf16.msra.mxu1 %v3868_v39 }
0x14d6   :  { %2599 = vmatprep.subr.bf16.mxu1 %v3873_v30 }
0x14d7   :  { %3450 = vmatpush3.bf16.msra.mxu0 %v3898_v14 }
0x14d8   :  { %3671 = vmatprep.subr.bf16.mxu0 %v4194_v4 }
0x14d9   :  { %2600 = vmatpush1.bf16.msra.mxu1 %v3871_v17 }
0x14da   :  { %2601 = vmatprep.subr.bf16.mxu1 %v3876_v40 }
0x14dd   :  { %2602 = vmatpush1.bf16.msra.mxu1 %v3874_v41 }
0x14de   :  { %2603 = vmatprep.subr.bf16.mxu1 %v3879_v42 }
0x14e1   :  { %2604 = vmatpush1.bf16.msra.mxu1 %v3877_v35 }
0x14e2   :  { %2605 = vmatprep.subr.bf16.mxu1 %v3882_v43 }
0x14e5   :  { %2606 = vmatpush1.bf16.msra.mxu1 %v3880_v44 }
0x14e6   :  { %3651 = vmatprep.subr.bf16.mxu1 %v4194_v4 }
0x155b   :  { %v2443_v63 = vpop.xlane.xlu0 %2442 }
0x155c   :  { %v2446_v28 = vmul.f32 0.0078125, %v2443_v63 }
0x155d   :  { %v2445_v54 = vpop.xlane.xlu1 %2444 }
0x155e   :  { %v2448_v56 = vsub.f32 %v2436_v29, %v2446_v28  ;;  %v2447_v31 = vmul.f32 0.0078125, %v2445_v54  ;;  %v2508_v29 = vrot.slane %v3290_v24, %v4462_v58 }
0x1560   :  { %v2449_v33 = vsub.f32 %v2437_v26, %v2447_v31  ;;  %v2450_v19 = vmul.f32 %v2448_v56, %v2448_v56 }
0x1562   :  { %2452 = vadd.xlane.f32.xlu0 %v2450_v19  ;;  %v2451_v34 = vmul.f32 %v2449_v33, %v2449_v33 }
0x1566   :  { %2454 = vadd.xlane.f32.xlu0 %v2451_v34 }
0x15ef   :  { %v2453_v45 = vpop.xlane.xlu0 %2452 }
0x15f0   :  { %v2456_v46 = vmul.f32 0.0078125, %v2453_v45 }
0x15f2   :  { %v2458_v47 = vadd.f32 1e-12, %v2456_v46 }
0x15f3   :  { %v2455_v48 = vpop.xlane.xlu0 %2454 }
0x15f4   :  { %3999 = vrsqrt.f32 %v2458_v47  ;;  %v2457_v32 = vmul.f32 0.0078125, %v2455_v48 }
0x15f6   :  { %v2459_v49 = vadd.f32 1e-12, %v2457_v32 }
0x15f8   :  { %4001 = vrsqrt.f32 %v2459_v49 }
0x15fe   :  { %v4000_v52 = vpop.eup %3999 }
0x15ff   :  { %v2462_v53 = vmul.f32 %v4000_v52, %v2448_v56 }
0x1601   :  { %v2470_v1 = vmul.f32 %v3272_v57, %v2462_v53 }
0x1602   :  { %v4002_v59 = vpop.eup %4001 }
0x1603   :  { %v2463_v61 = vmul.f32 %v4002_v59, %v2449_v33  ;;  %v4891_v5 = vadd.f32 %v3273_v2, %v2470_v1 }
0x1605   :  { %v2471_v3 = vmul.f32 %v3272_v57, %v2463_v61 }
0x1607   :  { %v4893_v6 = vadd.f32 %v3273_v2, %v2471_v3 }
0x1609   :  { %v2480_v7 = vpack.c.bf16 %v4893_v6, %v4891_v5 }
0x160b   :  { %2624 = vmatmul.mubr.bf16.vlgmr.msra.gmra.mrb[60].mxu1 %v2480_v7 }
0x160c   :  { %3667 = vmatprep.mubr.msk.bf16.mxu1 %vm4196_vm0, %v4194_v4 }
0x16de   :  { %v2625_v26 = vpop.f32.mrb[60].mxu1 }
0x16df   :  { %v2626_v62 = vadd.f32 %v2625_v26, %v2504_v25  ;;  %v2627_v27 = vpop.f32.mrb[61].mxu1 }
0x16e0   :  { %v2628_v0 = vadd.f32 %v2627_v27, %v2508_v29  ;;  %v2629_v11 = vpop.f32.mrb[62].mxu1 }
0x16e1   :  { %v2634_v63 = vmul.f32 %v2626_v62, %v2626_v62  ;;  %v2630_v28 = vadd.f32 %v2629_v11, %v2504_v25  ;;  %v2631_v54 = vpop.f32.mrb[63].mxu1  ;;  %v3899_v11 = vld [vmem:[#allocation10] sm:$0xff]  }
0x16e2   :  { %v2635_v56 = vmul.f32 %v2628_v0, %v2628_v0  ;;  %v2632_v31 = vadd.f32 %v2631_v54, %v2508_v29  ;;  %3652 = vmatpush3.bf16.msra.mxu1 %v3899_v11  ;;  %v3904_v54 = vld [vmem:[#allocation10 + $0x28] sm:$0xff]  }
0x16e3   :  { %v2638_v33 = vmul.f32 %v2634_v63, %v2626_v62  ;;  %v2636_v19 = vmul.f32 %v2630_v28, %v2630_v28  ;;  %3653 = vmatprep.subr.bf16.mxu1 %v4194_v4  ;;  %v3900_v63 = vld [vmem:[#allocation10 + $0x8] sm:$0xff]  }
0x16e4   :  { %v2639_v34 = vmul.f32 %v2635_v56, %v2628_v0  ;;  %v2637_v36 = vmul.f32 %v2632_v31, %v2632_v31  ;;  %v3905_v56 = vld [vmem:[#allocation10 + $0x30] sm:$0xff]  }
0x16e5   :  { %v2642_v37 = vmul.f32 0.044715, %v2638_v33  ;;  %v2640_v38 = vmul.f32 %v2636_v19, %v2630_v28  ;;  %v3907_v33 = vld [vmem:[%s4971_s18] sm:$0xff]   ;;  %v3908_v19 = vld [vmem:[%s4971_s18 + $0x8] sm:$0xff]  }
0x16e6   :  { %v2643_v39 = vmul.f32 0.044715, %v2639_v34  ;;  %v2641_v55 = vmul.f32 %v2637_v36, %v2632_v31  ;;  %3654 = vmatpush3.bf16.msra.mxu1 %v3900_v63  ;;  %v3909_v34 = vld [vmem:[%s4971_s18 + $0x10] sm:$0xff]   ;;  %v3910_v36 = vld [vmem:[%s4971_s18 + $0x18] sm:$0xff]  }
0x16e7   :  { %v2646_v30 = vadd.f32 %v2642_v37, %v2626_v62  ;;  %v2644_v58 = vmul.f32 0.044715, %v2640_v38  ;;  %3655 = vmatprep.subr.bf16.mxu1 %v4194_v4 }
0x16e8   :  { %v2647_v17 = vadd.f32 %v2643_v39, %v2628_v0  ;;  %v2645_v40 = vmul.f32 0.044715, %v2641_v55 }
0x16e9   :  { %v2650_v41 = vmul.f32 0.7978846, %v2646_v30  ;;  %v2648_v42 = vadd.f32 %v2644_v58, %v2630_v28 }
0x16ea   :  { %v2651_v35 = vmul.f32 0.7978846, %v2647_v17  ;;  %v2649_v43 = vadd.f32 %v2645_v40, %v2632_v31  ;;  %v3325_v40 = vld [vmem:[#allocation7 + $0x1] ss:$0 sm:$0xff] }
0x16eb   :  { %4003 = vtanh.f32 %v2650_v41  ;;  %v2652_v44 = vmul.f32 0.7978846, %v2648_v42 }
0x16ec   :  { %4005 = vtanh.f32 %v2651_v35  ;;  %v2653_v45 = vmul.f32 0.7978846, %v2649_v43  ;;  %v3326_v35 = vld [vmem:[#allocation8 + $0x1] ss:$0 sm:$0xff] }
0x16ed   :  { %4007 = vtanh.f32 %v2652_v44 }
0x16ee   :  { %4009 = vtanh.f32 %v2653_v45 }
0x16f5   :  { %v4004_v46 = vpop.eup %4003 }
0x16f6   :  { %v4006_v47 = vpop.eup %4005  ;;  %v2658_v48 = vadd.f32 1.0, %v4004_v46 }
0x16f7   :  { %v4008_v32 = vpop.eup %4007  ;;  %v2659_v49 = vadd.f32 1.0, %v4006_v47 }
0x16f8   :  { %v4010_v52 = vpop.eup %4009  ;;  %v2662_v53 = vmul.f32 0.5, %v2658_v48  ;;  %v2660_v57 = vadd.f32 1.0, %v4008_v32 }
0x16f9   :  { %v2661_v59 = vadd.f32 1.0, %v4010_v52  ;;  %v2663_v61 = vmul.f32 0.5, %v2659_v49  ;;  %v3911_v49 = vld [vmem:[%s4971_s18 + $0x20] sm:$0xff]   ;;  %v3912_v52 = vld [vmem:[%s4971_s18 + $0x28] sm:$0xff]  }
0x16fa   :  { %v2664_v1 = vmul.f32 0.5, %v2660_v57  ;;  %v2666_v3 = vmul.f32 %v2662_v53, %v2626_v62  ;;  %v3913_v53 = vld [vmem:[%s4971_s18 + $0x30] sm:$0xff]   ;;  %v3914_v57 = vld [vmem:[%s4971_s18 + $0x38] sm:$0xff]  }
0x16fb   :  { %v2665_v2 = vmul.f32 0.5, %v2661_v59  ;;  %v2667_v8 = vmul.f32 %v2663_v61, %v2628_v0  ;;  %v3327_v59 = vld [vmem:[#allocation11] ss:$0 sm:$0xff] }
0x16fc   :  { %v2668_v7 = vmul.f32 %v2664_v1, %v2630_v28  ;;  %v3903_v28 = vld [vmem:[#allocation10 + $0x20] sm:$0xff]  }
0x16fd   :  { %v2669_v9 = vmul.f32 %v2665_v2, %v2632_v31  ;;  %v3906_v31 = vld [vmem:[#allocation10 + $0x38] sm:$0xff]  }
0x16fe   :  { %v2670_v10 = vpack.c.bf16 %v2668_v7, %v2666_v3 }
0x16ff   :  { %v2671_v12 = vpack.c.bf16 %v2669_v9, %v2667_v8 }
0x1701   :  { %2841 = vmatprep.mubr.bf16.mxu0 %v2671_v12 }
0x1702   :  { %2842 = vmatmul.mubr.bf16.vlgmr.msra.gmra.mrb[36].mxu0 %v2670_v10  ;;  %v3336_v10 = vld [vmem:[#allocation13] ss:$0 sm:$0xff] }
0x1703   :  { %3687 = vmatprep.mubr.msk.bf16.mxu0 %vm4196_vm0, %v4194_v4  ;;  %3672 = vmatpush3.bf16.msra.mxu0 %v3907_v33 }
0x1704   :  { %3673 = vmatprep.subr.bf16.mxu0 %v4194_v4 }
0x1707   :  { %3674 = vmatpush3.bf16.msra.mxu0 %v3908_v19 }
0x1708   :  { %3675 = vmatprep.subr.bf16.mxu0 %v4194_v4 }
0x170b   :  { %3676 = vmatpush3.bf16.msra.mxu0 %v3909_v34 }
0x170c   :  { %3677 = vmatprep.subr.bf16.mxu0 %v4194_v4 }
0x170f   :  { %3678 = vmatpush3.bf16.msra.mxu0 %v3910_v36 }
0x1710   :  { %3679 = vmatprep.subr.bf16.mxu0 %v4194_v4 }
0x1713   :  { %3680 = vmatpush3.bf16.msra.mxu0 %v3911_v49 }
0x1714   :  { %3681 = vmatprep.subr.bf16.mxu0 %v4194_v4 }
0x1717   :  { %3682 = vmatpush3.bf16.msra.mxu0 %v3912_v52 }
0x1718   :  { %3683 = vmatprep.subr.bf16.mxu0 %v4194_v4 }
0x171b   :  { %3684 = vmatpush3.bf16.msra.mxu0 %v3913_v53 }
0x171c   :  { %3685 = vmatprep.subr.bf16.mxu0 %v4194_v4 }
0x171f   :  { %3686 = vmatpush3.bf16.msra.mxu0 %v3914_v57 }
0x17d5   :  { %v3451_v60 = vpop.f32.mrb[36].mxu0 }
0x17d6   :  { %v3452_v16 = vpop.f32.mrb[37].mxu0 }
0x17d7   :  { %v3453_v18 = vadd.f32 %v3452_v16, %v3451_v60  ;;  %v3454_v20 = vpop.f32.mrb[38].mxu0 }
0x17d8   :  { %v3455_v21 = vpop.f32.mrb[39].mxu0 }
0x17d9   :  { %v2844_v22 = vadd.f32 %v3453_v18, %v3308_v13  ;;  %v3456_v50 = vadd.f32 %v3455_v21, %v3454_v20 }
0x17db   :  { %v2847_v15 = vadd.f32 %v3456_v50, %v3308_v13  ;;  %v2850_v51 = vadd.f32 %v2844_v22, %v4891_v5  ;;  %v3901_v5 = vld [vmem:[#allocation10 + $0x10] sm:$0xff]  }
0x17dc   :  { %3656 = vmatpush3.bf16.msra.mxu1 %v3901_v5 }
0x17dd   :  { %2856 = vadd.xlane.f32.xlu0 %v2850_v51  ;;  %v2851_v23 = vadd.f32 %v2847_v15, %v4893_v6  ;;  %3657 = vmatprep.subr.bf16.mxu1 %v4194_v4  ;;  %v3902_v6 = vld [vmem:[#allocation10 + $0x18] sm:$0xff]  }
0x17df   :  { %2858 = vadd.xlane.f32.xlu1 %v2851_v23 }
0x17e0   :  { %3658 = vmatpush3.bf16.msra.mxu1 %v3902_v6 }
0x17e1   :  { %3659 = vmatprep.subr.bf16.mxu1 %v4194_v4 }
0x17e4   :  { %3660 = vmatpush3.bf16.msra.mxu1 %v3903_v28 }
0x17e5   :  { %3661 = vmatprep.subr.bf16.mxu1 %v4194_v4 }
0x17e8   :  { %3662 = vmatpush3.bf16.msra.mxu1 %v3904_v54 }
0x17e9   :  { %3663 = vmatprep.subr.bf16.mxu1 %v4194_v4 }
0x17ec   :  { %3664 = vmatpush3.bf16.msra.mxu1 %v3905_v56 }
0x17ed   :  { %3665 = vmatprep.subr.bf16.mxu1 %v4194_v4 }
0x17f0   :  { %3666 = vmatpush3.bf16.msra.mxu1 %v3906_v31 }
0x186a   :  { %v2857_v14 = vpop.xlane.xlu0 %2856 }
0x186b   :  { %v2860_v24 = vmul.f32 0.0078125, %v2857_v14 }
0x186c   :  { %v2859_v25 = vpop.xlane.xlu1 %2858 }
0x186d   :  { %v2862_v29 = vsub.f32 %v2850_v51, %v2860_v24  ;;  %v2861_v26 = vmul.f32 0.0078125, %v2859_v25 }
0x186f   :  { %v2863_v62 = vsub.f32 %v2851_v23, %v2861_v26  ;;  %v2864_v27 = vmul.f32 %v2862_v29, %v2862_v29 }
0x1871   :  { %2866 = vadd.xlane.f32.xlu0 %v2864_v27  ;;  %v2865_v0 = vmul.f32 %v2863_v62, %v2863_v62 }
0x1873   :  { %2868 = vadd.xlane.f32.xlu1 %v2865_v0 }
0x18fe   :  { %v2867_v37 = vpop.xlane.xlu0 %2866 }
0x18ff   :  { %v2870_v38 = vmul.f32 0.0078125, %v2867_v37 }
0x1900   :  { %v2869_v39 = vpop.xlane.xlu1 %2868 }
0x1901   :  { %v2872_v55 = vadd.f32 1e-12, %v2870_v38  ;;  %v2871_v30 = vmul.f32 0.0078125, %v2869_v39 }
0x1903   :  { %4011 = vrsqrt.f32 %v2872_v55  ;;  %v2873_v58 = vadd.f32 1e-12, %v2871_v30 }
0x1905   :  { %4013 = vrsqrt.f32 %v2873_v58 }
0x190d   :  { %v4012_v17 = vpop.eup %4011 }
0x190e   :  { %v2876_v41 = vmul.f32 %v4012_v17, %v2862_v29 }
0x190f   :  { %v4014_v42 = vpop.eup %4013 }
0x1910   :  { %v2884_v43 = vmul.f32 %v3325_v40, %v2876_v41  ;;  %v2877_v44 = vmul.f32 %v4014_v42, %v2863_v62 }
0x1912   :  { %v2892_v45 = vadd.f32 %v3326_v35, %v2884_v43  ;;  %v2885_v46 = vmul.f32 %v3325_v40, %v2877_v44 }
0x1914   :  { %2894 = vst [vmem:[#allocation2] sm:$0xff] %v2892_v45  ;;  %v2893_v47 = vadd.f32 %v3326_v35, %v2885_v46 }
0x1916   :  { %2895 = vst [vmem:[#allocation2 + $0x8] sm:$0xff] %v2893_v47 }
0x191d   :  { %v2896_v48 = vld [vmem:[#allocation2] ss:$8 sm:$0x3] }
0x191e   :  { %v2897_v32 = vpack.c.bf16 %v2896_v48, %v2896_v48 }
0x1920   :  { %3668 = vmatmul.mubr.bf16.vlgmr.msra.gmra.mrb[64].mxu1 %v2897_v32 }
0x19f3   :  { %v3003_v61 = vpop.f32.mrb[64].mxu1 }
0x19f4   :  { %v3004_v1 = vadd.f32 %v3327_v59, %v3003_v61  ;;  %v3669_v2 = vpop.f32.mrb[65].mxu1 }
0x19f5   :  { %v3006_v3 = vpop.f32.mrb[66].mxu1 }
0x19f6   :  { %4015 = vtanh.f32 %v3004_v1  ;;  %v3670_v7 = vpop.f32.mrb[67].mxu1 }
0x1a00   :  { %v4016_v8 = vpop.eup %4015 }
0x1a01   :  { %v3010_v9 = vpack.c.bf16 %v4016_v8, %v4016_v8 }
0x1a03   :  { %3688 = vmatmul.mubr.bf16.vlgmr.msra.gmra.mrb[40].mxu0 %v3010_v9 }
0x1ad6   :  { %v3116_v12 = vpop.f32.mrb[40].mxu0 }
0x1ad7   :  { %v3117_v60 = vadd.f32 %v3336_v10, %v3116_v12  ;;  %v3689_v13 = vpop.f32.mrb[41].mxu0 }
0x1ad8   :  { %v3119_v4 = vpop.f32.mrb[42].mxu0 }
0x1ad9   :  { %3122 = vst [vmem:[%s4993_s19] sm:$0x3] %v3117_v60  ;;  %v3690_v16 = vpop.f32.mrb[43].mxu0 }
0x1ada   :  { %3127 = vsyncpa [#allocation4], 1 }
0x1adb   :  { %3128 = vsyncpa [#allocation6], 1 }
0x1adc   :  { %3129 = vsyncpa [#allocation9], 1 }
0x1add   :  { %3130 = vsyncpa [#allocation12], 1 }

</bundles_post_ra>
